<compile_context>
chip_gen: v5e
topology: v5e:2x2
jax: 0.10.0
libtpu: 0.0.40
codegen_flags: <defaults>
</compile_context>

<pallas_src>
import functools

import numpy as np
import jax
import jax.numpy as jnp
from jax.experimental import pallas as pl
from jax.experimental.pallas import tpu as pltpu

FOREGROUND_MAP = [5, 6, 7, 11, 12, 13, 14, 15, 16, 17, 18]
NEG_SLOPE = 0.2  # LeakyReLU(0.2)


# ------------------------------ helpers --------------------------------------

def _round_up(x, m):
    return (x + m - 1) // m * m


@functools.lru_cache(maxsize=None)
def _vmem_budget():
    """(vmem_limit_bytes, row_tile_cap) gated by TPU generation."""
    try:
        cap = pltpu.get_tpu_info().vmem_capacity_bytes
    except Exception:
        cap = 64 * 1024 * 1024
    if cap >= 100 * 1024 * 1024:          # v5e / v6e: 128 MiB physical VMEM
        return 64 * 1024 * 1024, 1024
    return 32 * 1024 * 1024, 512          # v7x: 64 MiB physical VMEM


def _pick_row_tile(M, cap, K, Np, budget):
    """Row tile: multiple of 16 (bf16 sublane packing), capped & VMEM-checked."""
    def footprint(t):
        # double-buffered A + resident W + double-buffered out (+ weight map)
        return 2 * (t * K * 2 + K * Np * 2 + t * Np * 4 + t * Np * 2)

    tm = cap if M >= cap else _round_up(M, 16)
    while tm > 16 and footprint(tm) > budget:
        tm = max(16, (tm // 2) // 16 * 16)
    Mp = _round_up(M, tm)
    return tm, Mp


# --------------------------- Pallas kernels ---------------------------------

def _mm_bias_act_kernel(a_ref, w_ref, b_ref, o_ref, *, act):
    """(tm, K) x (K, Np) + bias [+ LeakyReLU]; full-K, weight stays resident."""
    y = jnp.dot(a_ref[...], w_ref[...], preferred_element_type=jnp.float32)
    y = y + b_ref[...]
    if act:
        y = jnp.where(y >= 0, y, NEG_SLOPE * y)
    o_ref[...] = y.astype(o_ref.dtype)


def matmul_bias(a, w, b, act, out_dtype=jnp.bfloat16):
    """a:(M,K) @ w:(K,N) + b:(N,) [+ LeakyReLU] -> (Mp, Np) out_dtype (padded)."""
    a = a.astype(jnp.bfloat16)
    M, K = a.shape
    N = w.shape[1]
    Np = _round_up(N, 128)
    vmem_limit, row_cap = _vmem_budget()
    tm, Mp = _pick_row_tile(M, row_cap, K, Np, vmem_limit)
    nm = Mp // tm

    a_p = a if Mp == M else jnp.pad(a, ((0, Mp - M), (0, 0)))
    w_p = w.astype(jnp.bfloat16)
    if Np != N:
        w_p = jnp.pad(w_p, ((0, 0), (0, Np - N)))
    b_p = jnp.pad(b.astype(jnp.float32), (0, Np - N)).reshape(1, Np)

    out = pl.pallas_call(
        functools.partial(_mm_bias_act_kernel, act=act),
        out_shape=jax.ShapeDtypeStruct((Mp, Np), out_dtype),
        grid=(nm,),
        in_specs=[
            pl.BlockSpec((tm, K), lambda i: (i, 0)),
            pl.BlockSpec((K, Np), lambda i: (0, 0)),   # constant index -> resident
            pl.BlockSpec((1, Np), lambda i: (0, 0)),
        ],
        out_specs=pl.BlockSpec((tm, Np), lambda i: (i, 0)),
        compiler_params=pltpu.CompilerParams(
            dimension_semantics=("parallel",),
            vmem_limit_bytes=vmem_limit),
    )(a_p, w_p, b_p)
    return out  # padded; caller slices valid rows / channels


def _conv_reduce_kernel(*refs, act, weighted, pad_rows, nl):
    """Conv matmul + bias [+LeakyReLU] [* weight map], summed over the tile's
    spatial rows; per-(batch, L-tile) partial written to its own output block."""
    if weighted:
        a_ref, w_ref, b_ref, m_ref, o_ref = refs
    else:
        a_ref, w_ref, b_ref, o_ref = refs

    y = jnp.dot(a_ref[0], w_ref[...], preferred_element_type=jnp.float32)
    y = y + b_ref[...]                                           # (tl, Np)
    if act:
        y = jnp.where(y >= 0, y, NEG_SLOPE * y)
    if weighted:
        y = y * m_ref[0].astype(jnp.float32)
    r = jnp.sum(y, axis=0, keepdims=True)                        # (1, Np)

    if (not weighted) and pad_rows:
        # zero-padded A rows each contribute (activated) bias; subtract once on
        # the last L tile instead of building a (tl, Np) iota mask.
        bb = b_ref[...]
        if act:
            bb = jnp.where(bb >= 0, bb, NEG_SLOPE * bb)
        r = jnp.where(pl.program_id(1) == nl - 1, r - pad_rows * bb, r)

    o_ref[0, 0] = jnp.broadcast_to(r, (8, r.shape[-1]))


def conv_reduce(x_nhwc, w_pt, b, stride, padding, act, weight_map=None):
    """Conv2d (PyTorch weight layout) fused with optional LeakyReLU, optional
    per-element weighting, and sum over the spatial output -> (B, Cout)."""
    x_nhwc = x_nhwc.astype(jnp.bfloat16)
    cout, cin, k, _ = w_pt.shape
    cols, (B, Ho, Wo) = _im2col(x_nhwc, k, stride, padding)      # (B, L, K) bf16
    L = Ho * Wo
    K = k * k * cin
    Np = _round_up(cout, 128)
    vmem_limit, row_cap = _vmem_budget()
    tl, Lp = _pick_row_tile(L, row_cap, K, Np, vmem_limit)
    nl = Lp // tl
    pad_rows = Lp - L

    a_p = cols if pad_rows == 0 else jnp.pad(cols, ((0, 0), (0, pad_rows), (0, 0)))
    w_mat = jnp.transpose(w_pt, (2, 3, 1, 0)).reshape(K, cout).astype(jnp.bfloat16)
    w_p = jnp.pad(w_mat, ((0, 0), (0, Np - cout)))
    b_p = jnp.pad(b.astype(jnp.float32), (0, Np - cout)).reshape(1, Np)

    weighted = weight_map is not None
    inputs = [a_p, w_p, b_p]
    in_specs = [
        pl.BlockSpec((1, tl, K), lambda b_, l: (b_, l, 0)),
        pl.BlockSpec((K, Np), lambda b_, l: (0, 0)),             # resident weight
        pl.BlockSpec((1, Np), lambda b_, l: (0, 0)),
    ]
    if weighted:
        m_p = jnp.pad(weight_map.astype(jnp.bfloat16),
                      ((0, 0), (0, pad_rows), (0, Np - cout)))
        inputs.append(m_p)
        in_specs.append(pl.BlockSpec((1, tl, Np), lambda b_, l: (b_, l, 0)))

    out = pl.pallas_call(
        functools.partial(_conv_reduce_kernel, act=act, weighted=weighted,
                          pad_rows=pad_rows, nl=nl),
        out_shape=jax.ShapeDtypeStruct((B, nl, 8, Np), jnp.float32),
        grid=(B, nl),
        in_specs=in_specs,
        out_specs=pl.BlockSpec((1, 1, 8, Np), lambda b_, l: (b_, l, 0, 0)),
        compiler_params=pltpu.CompilerParams(
            dimension_semantics=("parallel", "parallel"),
            vmem_limit_bytes=vmem_limit),
    )(*inputs)
    # tiny (B, nl, cout) reduction over L tiles stays in XLA
    return jnp.sum(out[:, :, 0, :cout], axis=1)


# ------------------------------ JAX glue -------------------------------------

def _im2col(x, k, s, p):
    """x: (B,H,W,C) NHWC -> (B, Ho*Wo, k*k*C) in x.dtype, patch order (kh,kw,C)."""
    if p:
        x = jnp.pad(x, ((0, 0), (p, p), (p, p), (0, 0)))
    B, H, W, C = x.shape
    Ho = (H - k) // s + 1
    Wo = (W - k) // s + 1
    cols = []
    for kh in range(k):
        for kw in range(k):
            cols.append(x[:, kh:kh + s * (Ho - 1) + 1:s,
                          kw:kw + s * (Wo - 1) + 1:s, :])
    cols = jnp.stack(cols, axis=3)               # (B, Ho, Wo, k*k, C)
    return cols.reshape(B, Ho * Wo, k * k * C), (B, Ho, Wo)


def conv2d(x_nhwc, w_pt, b, stride, padding, act, out_dtype=jnp.bfloat16):
    """Conv2d with PyTorch weight (Cout,Cin,k,k) via bf16 im2col + Pallas matmul."""
    x_nhwc = x_nhwc.astype(jnp.bfloat16)
    cout, cin, k, _ = w_pt.shape
    cols, (B, Ho, Wo) = _im2col(x_nhwc, k, stride, padding)
    M, K = B * Ho * Wo, k * k * cin
    w_mat = jnp.transpose(w_pt, (2, 3, 1, 0)).reshape(K, cout)
    out = matmul_bias(cols.reshape(M, K), w_mat, b, act, out_dtype)
    return out[:M, :cout].reshape(B, Ho, Wo, cout)


def _bilinear_matrix(out_size, in_size):
    """Row-interpolation matrix for bilinear resize with align_corners=True."""
    m = np.zeros((out_size, in_size), dtype=np.float32)
    if out_size == 1:
        m[0, 0] = 1.0
        return jnp.asarray(m)
    pos = np.arange(out_size, dtype=np.float64) * (in_size - 1) / (out_size - 1)
    i0 = np.clip(np.floor(pos).astype(np.int64), 0, in_size - 1)
    i1 = np.minimum(i0 + 1, in_size - 1)
    frac = (pos - i0).astype(np.float32)
    for o in range(out_size):
        m[o, i0[o]] += 1.0 - frac[o]
        m[o, i1[o]] += frac[o]
    return jnp.asarray(m)


def _spectral_normalize(w, key, n_iter=10, eps=1e-12):
    """Deterministic power-iteration spectral norm (approximates PyTorch's
    spectral_norm; PyTorch updates u/v per forward so trained checkpoints
    will not match exactly)."""
    w2d = w.reshape(w.shape[0], -1)
    u = jax.random.normal(key, (w2d.shape[0],), jnp.float32)
    u = u / (jnp.linalg.norm(u) + eps)
    for _ in range(n_iter):
        v = w2d.T @ u
        v = v / (jnp.linalg.norm(v) + eps)
        u = w2d @ v
        u = u / (jnp.linalg.norm(u) + eps)
    sigma = jnp.dot(u, w2d @ v)
    return w / sigma


def init_params(key, num_classes, ndf, prior_hw=(16, 16)):
    n = len(FOREGROUND_MAP)
    ks = jax.random.split(key, 20)

    def conv_init(k1, k2, cout, cin, ksize):
        fan_in = cin * ksize * ksize
        bound = 1.0 / np.sqrt(fan_in)
        w = jax.random.uniform(k1, (cout, cin, ksize, ksize), jnp.float32, -bound, bound)
        b = jax.random.uniform(k2, (cout,), jnp.float32, -bound, bound)
        return w, b

    c1w, c1b = conv_init(ks[0], ks[1], ndf, num_classes, 4)
    c2w, c2b = conv_init(ks[2], ks[3], ndf * 2, ndf, 4)
    c3w, c3b = conv_init(ks[4], ks[5], ndf * 4, ndf * 2, 4)
    c4w, c4b = conv_init(ks[6], ks[7], ndf * 8, ndf * 4, 4)
    pw, pb = conv_init(ks[8], ks[9], n, ndf, 3)

    fc_bound = 1.0 / np.sqrt(ndf * 8)
    fc_w = jax.random.uniform(ks[10], (1, ndf * 8), jnp.float32, -fc_bound, fc_bound)
    fc_b = jax.random.uniform(ks[11], (1,), jnp.float32, -fc_bound, fc_bound)

    # spectral_norm wrappers (weight / sigma)
    c1w = _spectral_normalize(c1w, jax.random.fold_in(ks[12], 0))
    c2w = _spectral_normalize(c2w, jax.random.fold_in(ks[12], 1))
    c3w = _spectral_normalize(c3w, jax.random.fold_in(ks[12], 2))
    c4w = _spectral_normalize(c4w, jax.random.fold_in(ks[12], 3))
    pw = _spectral_normalize(pw, jax.random.fold_in(ks[12], 4))
    fc_w = _spectral_normalize(fc_w, jax.random.fold_in(ks[12], 5))

    # TODO(synk): real spatial prior is loaded from ./model/prior_array.mat;
    # here a deterministic synthetic prior in [0, 1] is used instead.
    spatial_matrix = jax.random.uniform(ks[13], (n,) + prior_hw, jnp.float32, 0.0, 1.0)

    gamma = jnp.zeros((n,), jnp.float32)  # defined in __init__, unused in forward

    return dict(
        conv1_w=c1w, conv1_b=c1b, conv2_w=c2w, conv2_b=c2b,
        conv3_w=c3w, conv3_b=c3b, conv4_w=c4w, conv4_b=c4b,
        proj_w=pw, proj_b=pb,
        fc_w_mat=jnp.transpose(fc_w, (1, 0)), fc_b=fc_b,
        spatial_matrix=spatial_matrix, gamma=gamma,
    )


def forward(x_nchw, params):
    x_nhwc = jnp.transpose(x_nchw, (0, 2, 3, 1))
    B, H, W, _ = x_nhwc.shape
    n = len(FOREGROUND_MAP)

    h1 = conv2d(x_nhwc, params["conv1_w"], params["conv1_b"], 2, 1, act=True)  # bf16
    Ho, Wo = h1.shape[1], h1.shape[2]

    # spatial_info = (1 + upsample(spatial_prior)) * upsample(input_foreground)
    # bilinear (align_corners=True) resize via separable interpolation matrices
    sm = params["spatial_matrix"]                                      # (n, Hp, Wp)
    L_sm = _bilinear_matrix(Ho, sm.shape[1])
    R_sm = _bilinear_matrix(Wo, sm.shape[2])
    sm_up = jnp.einsum("oh,chw,pw->cop", L_sm, sm, R_sm)               # (n, Ho, Wo)

    fg = x_nchw[:, jnp.asarray(FOREGROUND_MAP)].astype(jnp.float32)    # (B, n, H, W)
    L_in = _bilinear_matrix(Ho, H)
    R_in = _bilinear_matrix(Wo, W)
    fg_up = jnp.einsum("oh,bchw,pw->bcop", L_in, fg, R_in)             # (B, n, Ho, Wo)

    spatial_info = ((1.0 + sm_up[None]) * fg_up).astype(jnp.bfloat16)  # (B, n, Ho, Wo)
    spatial_info = jnp.transpose(spatial_info, (0, 2, 3, 1)).reshape(B, Ho * Wo, n)

    # proj conv fused with (1 + prior) * foreground weighting + spatial sum
    proj_sum = conv_reduce(h1, params["proj_w"], params["proj_b"], 1, 1,
                           act=False, weight_map=spatial_info)         # (B, n) f32

    h2 = conv2d(h1, params["conv2_w"], params["conv2_b"], 2, 1, act=True)
    h3 = conv2d(h2, params["conv3_w"], params["conv3_b"], 2, 1, act=True)

    # conv4 + LeakyReLU + spatial sum -> (B, 8*ndf)
    H4 = (h3.shape[1] + 2 - 4) // 2 + 1
    W4 = (h3.shape[2] + 2 - 4) // 2 + 1
    if H4 * W4 >= 64:
        # big spatial extent: fuse the reduction, h4 never hits HBM
        x4_sum = conv_reduce(h3, params["conv4_w"], params["conv4_b"], 2, 1, act=True)
    else:
        # tiny spatial extent (demo: 1x1): flat matmul fills MXU rows better
        h4 = conv2d(h3, params["conv4_w"], params["conv4_b"], 2, 1, act=True,
                    out_dtype=jnp.float32)
        x4_sum = jnp.sum(h4, axis=(1, 2))

    # tiny tail: fc (C4 -> 1) + residual add, kept in plain XLA.
    y = x4_sum @ params["fc_w_mat"] + params["fc_b"]                   # (B, 1)
    return y + proj_sum                                                # (B, n)


if __name__ == "__main__":
    key = jax.random.PRNGKey(0)
    k_params, k_x = jax.random.split(key)

    # num_classes must cover foreground indices (max index 18) -> 19 classes.
    num_classes, ndf = 19, 16
    B, H, W = 2, 16, 16

    params = init_params(k_params, num_classes, ndf)
    x = jax.random.normal(k_x, (B, num_classes, H, W), jnp.float32)

    fwd = jax.jit(forward)
    out = jax.block_until_ready(fwd(x, params))

    assert out.shape == (B, len(FOREGROUND_MAP)), out.shape
    assert bool(jnp.all(jnp.isfinite(out)))
    print("KERNEL_OK")
</pallas_src>

<mosaic_0001>
module attributes {stable_mosaic.version = 11 : i64} {
  func.func @_mm_bias_act_kernel(%arg0: i32, %arg1: memref<128x304xbf16, #tpu.memory_space<vmem>>, %arg2: memref<304x128xbf16, #tpu.memory_space<vmem>>, %arg3: memref<1x128xf32, #tpu.memory_space<vmem>>, %arg4: memref<128x128xbf16, #tpu.memory_space<vmem>>) attributes {dimension_semantics = [#tpu.dimension_semantics<parallel>], iteration_bounds = array<i64: 1>, scalar_prefetch = 0 : i64, scratch_operands = 0 : i64, tpu.core_type = #tpu.core_type<tc>, window_params = [{transform_indices = @transform_0, window_bounds = array<i64: 128, 304>}, {pipeline_mode = #tpu.pipeline_mode<synchronous>, transform_indices = @transform_1, window_bounds = array<i64: 304, 128>}, {pipeline_mode = #tpu.pipeline_mode<synchronous>, transform_indices = @transform_2, window_bounds = array<i64: 1, 128>}, {transform_indices = @transform_3, window_bounds = array<i64: 128, 128>}]} {
    %c0 = arith.constant 0 : index
    %c0_0 = arith.constant 0 : index
    %0 = vector.load %arg1[%c0, %c0_0] : memref<128x304xbf16, #tpu.memory_space<vmem>>, vector<128x304xbf16>
    %c0_1 = arith.constant 0 : index
    %c0_2 = arith.constant 0 : index
    %1 = vector.load %arg2[%c0_1, %c0_2] : memref<304x128xbf16, #tpu.memory_space<vmem>>, vector<304x128xbf16>
    %cst = arith.constant dense<0.000000e+00> : vector<128x128xf32>
    %2 = tpu.matmul %0, %1, %cst {dimension_numbers = #tpu.dot_dimension_numbers<[1], [0], [0], [1], [0, 0, 1, 1], [], []>} : vector<128x304xbf16>, vector<304x128xbf16>, vector<128x128xf32> -> vector<128x128xf32>
    %c0_3 = arith.constant 0 : index
    %c0_4 = arith.constant 0 : index
    %3 = vector.load %arg3[%c0_3, %c0_4] : memref<1x128xf32, #tpu.memory_space<vmem>>, vector<1x128xf32>
    %4 = vector.broadcast %3 : vector<1x128xf32> to vector<128x128xf32>
    %5 = arith.addf %2, %4 : vector<128x128xf32>
    %cst_5 = arith.constant 0.000000e+00 : f32
    %6 = vector.broadcast %cst_5 : f32 to vector<128x128xf32>
    %7 = arith.cmpf oge, %5, %6 : vector<128x128xf32>
    %cst_6 = arith.constant 2.000000e-01 : f32
    %8 = vector.broadcast %cst_6 : f32 to vector<128x128xf32>
    %9 = arith.mulf %8, %5 : vector<128x128xf32>
    %10 = arith.select %7, %5, %9 : vector<128x128xi1>, vector<128x128xf32>
    %11 = arith.truncf %10 : vector<128x128xf32> to vector<128x128xbf16>
    %c0_7 = arith.constant 0 : index
    %c0_8 = arith.constant 0 : index
    %12 = vector.load %arg4[%c0_7, %c0_8] : memref<128x128xbf16, #tpu.memory_space<vmem>>, vector<128x128xbf16>
    tpu.vector_store %arg4[%c0_7, %c0_8], %11 {strides = array<i32>} : memref<128x128xbf16, #tpu.memory_space<vmem>>, vector<128x128xbf16>,
    return
  }
  func.func @transform_0(%arg0: i32) -> (i32, i32) {
    %c0_i32 = arith.constant 0 : i32
    %c0_i32_0 = arith.constant 0 : i32
    return %arg0, %c0_i32 : i32, i32
  }
  func.func @transform_1(%arg0: i32) -> (i32, i32) {
    %c0_i32 = arith.constant 0 : i32
    %c0_i32_0 = arith.constant 0 : i32
    %c0_i32_1 = arith.constant 0 : i32
    return %c0_i32, %c0_i32_0 : i32, i32
  }
  func.func @transform_2(%arg0: i32) -> (i32, i32) {
    %c0_i32 = arith.constant 0 : i32
    %c0_i32_0 = arith.constant 0 : i32
    %c0_i32_1 = arith.constant 0 : i32
    return %c0_i32, %c0_i32_0 : i32, i32
  }
  func.func @transform_3(%arg0: i32) -> (i32, i32) {
    %c0_i32 = arith.constant 0 : i32
    %c0_i32_0 = arith.constant 0 : i32
    return %arg0, %c0_i32 : i32, i32
  }
}

module attributes {stable_mosaic.version = 11 : i64} {
  func.func @_mm_bias_act_kernel(%arg0: i32, %arg1: memref<32x256xbf16, #tpu.memory_space<vmem>>, %arg2: memref<256x128xbf16, #tpu.memory_space<vmem>>, %arg3: memref<1x128xf32, #tpu.memory_space<vmem>>, %arg4: memref<32x128xbf16, #tpu.memory_space<vmem>>) attributes {dimension_semantics = [#tpu.dimension_semantics<parallel>], iteration_bounds = array<i64: 1>, scalar_prefetch = 0 : i64, scratch_operands = 0 : i64, tpu.core_type = #tpu.core_type<tc>, window_params = [{transform_indices = @transform_0, window_bounds = array<i64: 32, 256>}, {pipeline_mode = #tpu.pipeline_mode<synchronous>, transform_indices = @transform_1, window_bounds = array<i64: 256, 128>}, {pipeline_mode = #tpu.pipeline_mode<synchronous>, transform_indices = @transform_2, window_bounds = array<i64: 1, 128>}, {transform_indices = @transform_3, window_bounds = array<i64: 32, 128>}]} {
    %c0 = arith.constant 0 : index
    %c0_0 = arith.constant 0 : index
    %0 = vector.load %arg1[%c0, %c0_0] : memref<32x256xbf16, #tpu.memory_space<vmem>>, vector<32x256xbf16>
    %c0_1 = arith.constant 0 : index
    %c0_2 = arith.constant 0 : index
    %1 = vector.load %arg2[%c0_1, %c0_2] : memref<256x128xbf16, #tpu.memory_space<vmem>>, vector<256x128xbf16>
    %cst = arith.constant dense<0.000000e+00> : vector<32x128xf32>
    %2 = tpu.matmul %0, %1, %cst {dimension_numbers = #tpu.dot_dimension_numbers<[1], [0], [0], [1], [0, 0, 1, 1], [], []>} : vector<32x256xbf16>, vector<256x128xbf16>, vector<32x128xf32> -> vector<32x128xf32>
    %c0_3 = arith.constant 0 : index
    %c0_4 = arith.constant 0 : index
    %3 = vector.load %arg3[%c0_3, %c0_4] : memref<1x128xf32, #tpu.memory_space<vmem>>, vector<1x128xf32>
    %4 = vector.broadcast %3 : vector<1x128xf32> to vector<32x128xf32>
    %5 = arith.addf %2, %4 : vector<32x128xf32>
    %cst_5 = arith.constant 0.000000e+00 : f32
    %6 = vector.broadcast %cst_5 : f32 to vector<32x128xf32>
    %7 = arith.cmpf oge, %5, %6 : vector<32x128xf32>
    %cst_6 = arith.constant 2.000000e-01 : f32
    %8 = vector.broadcast %cst_6 : f32 to vector<32x128xf32>
    %9 = arith.mulf %8, %5 : vector<32x128xf32>
    %10 = arith.select %7, %5, %9 : vector<32x128xi1>, vector<32x128xf32>
    %11 = arith.truncf %10 : vector<32x128xf32> to vector<32x128xbf16>
    %c0_7 = arith.constant 0 : index
    %c0_8 = arith.constant 0 : index
    %12 = vector.load %arg4[%c0_7, %c0_8] : memref<32x128xbf16, #tpu.memory_space<vmem>>, vector<32x128xbf16>
    tpu.vector_store %arg4[%c0_7, %c0_8], %11 {strides = array<i32>} : memref<32x128xbf16, #tpu.memory_space<vmem>>, vector<32x128xbf16>,
    return
  }
  func.func @transform_0(%arg0: i32) -> (i32, i32) {
    %c0_i32 = arith.constant 0 : i32
    %c0_i32_0 = arith.constant 0 : i32
    return %arg0, %c0_i32 : i32, i32
  }
  func.func @transform_1(%arg0: i32) -> (i32, i32) {
    %c0_i32 = arith.constant 0 : i32
    %c0_i32_0 = arith.constant 0 : i32
    %c0_i32_1 = arith.constant 0 : i32
    return %c0_i32, %c0_i32_0 : i32, i32
  }
  func.func @transform_2(%arg0: i32) -> (i32, i32) {
    %c0_i32 = arith.constant 0 : i32
    %c0_i32_0 = arith.constant 0 : i32
    %c0_i32_1 = arith.constant 0 : i32
    return %c0_i32, %c0_i32_0 : i32, i32
  }
  func.func @transform_3(%arg0: i32) -> (i32, i32) {
    %c0_i32 = arith.constant 0 : i32
    %c0_i32_0 = arith.constant 0 : i32
    return %arg0, %c0_i32 : i32, i32
  }
}

module attributes {stable_mosaic.version = 11 : i64} {
  func.func @_mm_bias_act_kernel(%arg0: i32, %arg1: memref<16x512xbf16, #tpu.memory_space<vmem>>, %arg2: memref<512x128xbf16, #tpu.memory_space<vmem>>, %arg3: memref<1x128xf32, #tpu.memory_space<vmem>>, %arg4: memref<16x128xbf16, #tpu.memory_space<vmem>>) attributes {dimension_semantics = [#tpu.dimension_semantics<parallel>], iteration_bounds = array<i64: 1>, scalar_prefetch = 0 : i64, scratch_operands = 0 : i64, tpu.core_type = #tpu.core_type<tc>, window_params = [{transform_indices = @transform_0, window_bounds = array<i64: 16, 512>}, {pipeline_mode = #tpu.pipeline_mode<synchronous>, transform_indices = @transform_1, window_bounds = array<i64: 512, 128>}, {pipeline_mode = #tpu.pipeline_mode<synchronous>, transform_indices = @transform_2, window_bounds = array<i64: 1, 128>}, {transform_indices = @transform_3, window_bounds = array<i64: 16, 128>}]} {
    %c0 = arith.constant 0 : index
    %c0_0 = arith.constant 0 : index
    %0 = vector.load %arg1[%c0, %c0_0] : memref<16x512xbf16, #tpu.memory_space<vmem>>, vector<16x512xbf16>
    %c0_1 = arith.constant 0 : index
    %c0_2 = arith.constant 0 : index
    %1 = vector.load %arg2[%c0_1, %c0_2] : memref<512x128xbf16, #tpu.memory_space<vmem>>, vector<512x128xbf16>
    %cst = arith.constant dense<0.000000e+00> : vector<16x128xf32>
    %2 = tpu.matmul %0, %1, %cst {dimension_numbers = #tpu.dot_dimension_numbers<[1], [0], [0], [1], [0, 0, 1, 1], [], []>} : vector<16x512xbf16>, vector<512x128xbf16>, vector<16x128xf32> -> vector<16x128xf32>
    %c0_3 = arith.constant 0 : index
    %c0_4 = arith.constant 0 : index
    %3 = vector.load %arg3[%c0_3, %c0_4] : memref<1x128xf32, #tpu.memory_space<vmem>>, vector<1x128xf32>
    %4 = vector.broadcast %3 : vector<1x128xf32> to vector<16x128xf32>
    %5 = arith.addf %2, %4 : vector<16x128xf32>
    %cst_5 = arith.constant 0.000000e+00 : f32
    %6 = vector.broadcast %cst_5 : f32 to vector<16x128xf32>
    %7 = arith.cmpf oge, %5, %6 : vector<16x128xf32>
    %cst_6 = arith.constant 2.000000e-01 : f32
    %8 = vector.broadcast %cst_6 : f32 to vector<16x128xf32>
    %9 = arith.mulf %8, %5 : vector<16x128xf32>
    %10 = arith.select %7, %5, %9 : vector<16x128xi1>, vector<16x128xf32>
    %11 = arith.truncf %10 : vector<16x128xf32> to vector<16x128xbf16>
    %c0_7 = arith.constant 0 : index
    %c0_8 = arith.constant 0 : index
    %12 = vector.load %arg4[%c0_7, %c0_8] : memref<16x128xbf16, #tpu.memory_space<vmem>>, vector<16x128xbf16>
    tpu.vector_store %arg4[%c0_7, %c0_8], %11 {strides = array<i32>} : memref<16x128xbf16, #tpu.memory_space<vmem>>, vector<16x128xbf16>,
    return
  }
  func.func @transform_0(%arg0: i32) -> (i32, i32) {
    %c0_i32 = arith.constant 0 : i32
    %c0_i32_0 = arith.constant 0 : i32
    return %arg0, %c0_i32 : i32, i32
  }
  func.func @transform_1(%arg0: i32) -> (i32, i32) {
    %c0_i32 = arith.constant 0 : i32
    %c0_i32_0 = arith.constant 0 : i32
    %c0_i32_1 = arith.constant 0 : i32
    return %c0_i32, %c0_i32_0 : i32, i32
  }
  func.func @transform_2(%arg0: i32) -> (i32, i32) {
    %c0_i32 = arith.constant 0 : i32
    %c0_i32_0 = arith.constant 0 : i32
    %c0_i32_1 = arith.constant 0 : i32
    return %c0_i32, %c0_i32_0 : i32, i32
  }
  func.func @transform_3(%arg0: i32) -> (i32, i32) {
    %c0_i32 = arith.constant 0 : i32
    %c0_i32_0 = arith.constant 0 : i32
    return %arg0, %c0_i32 : i32, i32
  }
}

module attributes {stable_mosaic.version = 11 : i64} {
  func.func @_mm_bias_act_kernel(%arg0: i32, %arg1: memref<16x1024xbf16, #tpu.memory_space<vmem>>, %arg2: memref<1024x128xbf16, #tpu.memory_space<vmem>>, %arg3: memref<1x128xf32, #tpu.memory_space<vmem>>, %arg4: memref<16x128xf32, #tpu.memory_space<vmem>>) attributes {dimension_semantics = [#tpu.dimension_semantics<parallel>], iteration_bounds = array<i64: 1>, scalar_prefetch = 0 : i64, scratch_operands = 0 : i64, tpu.core_type = #tpu.core_type<tc>, window_params = [{transform_indices = @transform_0, window_bounds = array<i64: 16, 1024>}, {pipeline_mode = #tpu.pipeline_mode<synchronous>, transform_indices = @transform_1, window_bounds = array<i64: 1024, 128>}, {pipeline_mode = #tpu.pipeline_mode<synchronous>, transform_indices = @transform_2, window_bounds = array<i64: 1, 128>}, {transform_indices = @transform_3, window_bounds = array<i64: 16, 128>}]} {
    %c0 = arith.constant 0 : index
    %c0_0 = arith.constant 0 : index
    %0 = vector.load %arg1[%c0, %c0_0] : memref<16x1024xbf16, #tpu.memory_space<vmem>>, vector<16x1024xbf16>
    %c0_1 = arith.constant 0 : index
    %c0_2 = arith.constant 0 : index
    %1 = vector.load %arg2[%c0_1, %c0_2] : memref<1024x128xbf16, #tpu.memory_space<vmem>>, vector<1024x128xbf16>
    %cst = arith.constant dense<0.000000e+00> : vector<16x128xf32>
    %2 = tpu.matmul %0, %1, %cst {dimension_numbers = #tpu.dot_dimension_numbers<[1], [0], [0], [1], [0, 0, 1, 1], [], []>} : vector<16x1024xbf16>, vector<1024x128xbf16>, vector<16x128xf32> -> vector<16x128xf32>
    %c0_3 = arith.constant 0 : index
    %c0_4 = arith.constant 0 : index
    %3 = vector.load %arg3[%c0_3, %c0_4] : memref<1x128xf32, #tpu.memory_space<vmem>>, vector<1x128xf32>
    %4 = vector.broadcast %3 : vector<1x128xf32> to vector<16x128xf32>
    %5 = arith.addf %2, %4 : vector<16x128xf32>
    %cst_5 = arith.constant 0.000000e+00 : f32
    %6 = vector.broadcast %cst_5 : f32 to vector<16x128xf32>
    %7 = arith.cmpf oge, %5, %6 : vector<16x128xf32>
    %cst_6 = arith.constant 2.000000e-01 : f32
    %8 = vector.broadcast %cst_6 : f32 to vector<16x128xf32>
    %9 = arith.mulf %8, %5 : vector<16x128xf32>
    %10 = arith.select %7, %5, %9 : vector<16x128xi1>, vector<16x128xf32>
    %c0_7 = arith.constant 0 : index
    %c0_8 = arith.constant 0 : index
    %11 = vector.load %arg4[%c0_7, %c0_8] : memref<16x128xf32, #tpu.memory_space<vmem>>, vector<16x128xf32>
    tpu.vector_store %arg4[%c0_7, %c0_8], %10 {strides = array<i32>} : memref<16x128xf32, #tpu.memory_space<vmem>>, vector<16x128xf32>,
    return
  }
  func.func @transform_0(%arg0: i32) -> (i32, i32) {
    %c0_i32 = arith.constant 0 : i32
    %c0_i32_0 = arith.constant 0 : i32
    return %arg0, %c0_i32 : i32, i32
  }
  func.func @transform_1(%arg0: i32) -> (i32, i32) {
    %c0_i32 = arith.constant 0 : i32
    %c0_i32_0 = arith.constant 0 : i32
    %c0_i32_1 = arith.constant 0 : i32
    return %c0_i32, %c0_i32_0 : i32, i32
  }
  func.func @transform_2(%arg0: i32) -> (i32, i32) {
    %c0_i32 = arith.constant 0 : i32
    %c0_i32_0 = arith.constant 0 : i32
    %c0_i32_1 = arith.constant 0 : i32
    return %c0_i32, %c0_i32_0 : i32, i32
  }
  func.func @transform_3(%arg0: i32) -> (i32, i32) {
    %c0_i32 = arith.constant 0 : i32
    %c0_i32_0 = arith.constant 0 : i32
    return %arg0, %c0_i32 : i32, i32
  }
}

module attributes {stable_mosaic.version = 11 : i64} {
  func.func @_conv_reduce_kernel(%arg0: i32, %arg1: i32, %arg2: memref<1x64x144xbf16, #tpu.memory_space<vmem>>, %arg3: memref<144x128xbf16, #tpu.memory_space<vmem>>, %arg4: memref<1x128xf32, #tpu.memory_space<vmem>>, %arg5: memref<1x64x128xbf16, #tpu.memory_space<vmem>>, %arg6: memref<1x1x8x128xf32, #tpu.memory_space<vmem>>) attributes {dimension_semantics = [#tpu.dimension_semantics<parallel>, #tpu.dimension_semantics<parallel>], iteration_bounds = array<i64: 2, 1>, scalar_prefetch = 0 : i64, scratch_operands = 0 : i64, tpu.core_type = #tpu.core_type<tc>, window_params = [{transform_indices = @transform_0, window_bounds = array<i64: 1, 64, 144>}, {pipeline_mode = #tpu.pipeline_mode<synchronous>, transform_indices = @transform_1, window_bounds = array<i64: 144, 128>}, {pipeline_mode = #tpu.pipeline_mode<synchronous>, transform_indices = @transform_2, window_bounds = array<i64: 1, 128>}, {transform_indices = @transform_3, window_bounds = array<i64: 1, 64, 128>}, {transform_indices = @transform_4, window_bounds = array<i64: 1, 1, 8, 128>}]} {
    %c0 = arith.constant 0 : index
    %c0_0 = arith.constant 0 : index
    %c0_1 = arith.constant 0 : index
    %0 = vector.load %arg2[%c0, %c0_0, %c0_1] : memref<1x64x144xbf16, #tpu.memory_space<vmem>>, vector<1x64x144xbf16>
    %1 = vector.shape_cast %0 : vector<1x64x144xbf16> to vector<64x144xbf16>
    %c0_2 = arith.constant 0 : index
    %c0_3 = arith.constant 0 : index
    %2 = vector.load %arg3[%c0_2, %c0_3] : memref<144x128xbf16, #tpu.memory_space<vmem>>, vector<144x128xbf16>
    %cst = arith.constant dense<0.000000e+00> : vector<64x128xf32>
    %3 = tpu.matmul %1, %2, %cst {dimension_numbers = #tpu.dot_dimension_numbers<[1], [0], [0], [1], [0, 0, 1, 1], [], []>} : vector<64x144xbf16>, vector<144x128xbf16>, vector<64x128xf32> -> vector<64x128xf32>
    %c0_4 = arith.constant 0 : index
    %c0_5 = arith.constant 0 : index
    %4 = vector.load %arg4[%c0_4, %c0_5] : memref<1x128xf32, #tpu.memory_space<vmem>>, vector<1x128xf32>
    %5 = vector.broadcast %4 : vector<1x128xf32> to vector<64x128xf32>
    %6 = arith.addf %3, %5 : vector<64x128xf32>
    %c0_6 = arith.constant 0 : index
    %c0_7 = arith.constant 0 : index
    %c0_8 = arith.constant 0 : index
    %7 = vector.load %arg5[%c0_6, %c0_7, %c0_8] : memref<1x64x128xbf16, #tpu.memory_space<vmem>>, vector<1x64x128xbf16>
    %8 = vector.shape_cast %7 : vector<1x64x128xbf16> to vector<64x128xbf16>
    %9 = arith.extf %8 : vector<64x128xbf16> to vector<64x128xf32>
    %10 = arith.mulf %6, %9 : vector<64x128xf32>
    %cst_9 = arith.constant dense<0.000000e+00> : vector<128xf32>
    %11 = vector.multi_reduction <add>, %10, %cst_9 [0] : vector<64x128xf32> to vector<128xf32>
    %12 = vector.shape_cast %11 : vector<128xf32> to vector<1x128xf32>
    %13 = vector.shape_cast %12 : vector<1x128xf32> to vector<1x128xf32>
    %14 = vector.broadcast %13 : vector<1x128xf32> to vector<8x128xf32>
    %c0_10 = arith.constant 0 : index
    %c0_11 = arith.constant 0 : index
    %c0_12 = arith.constant 0 : index
    %c0_13 = arith.constant 0 : index
    %15 = vector.load %arg6[%c0_10, %c0_11, %c0_12, %c0_13] : memref<1x1x8x128xf32, #tpu.memory_space<vmem>>, vector<1x1x8x128xf32>
    %16 = vector.shape_cast %15 : vector<1x1x8x128xf32> to vector<8x128xf32>
    %17 = vector.shape_cast %14 : vector<8x128xf32> to vector<1x1x8x128xf32>
    tpu.vector_store %arg6[%c0_10, %c0_11, %c0_12, %c0_13], %17 {strides = array<i32>} : memref<1x1x8x128xf32, #tpu.memory_space<vmem>>, vector<1x1x8x128xf32>,
    return
  }
  func.func @transform_0(%arg0: i32, %arg1: i32) -> (i32, i32, i32) {
    %c0_i32 = arith.constant 0 : i32
    %c0_i32_0 = arith.constant 0 : i32
    return %arg0, %arg1, %c0_i32 : i32, i32, i32
  }
  func.func @transform_1(%arg0: i32, %arg1: i32) -> (i32, i32) {
    %c0_i32 = arith.constant 0 : i32
    %c0_i32_0 = arith.constant 0 : i32
    %c0_i32_1 = arith.constant 0 : i32
    return %c0_i32, %c0_i32_0 : i32, i32
  }
  func.func @transform_2(%arg0: i32, %arg1: i32) -> (i32, i32) {
    %c0_i32 = arith.constant 0 : i32
    %c0_i32_0 = arith.constant 0 : i32
    %c0_i32_1 = arith.constant 0 : i32
    return %c0_i32, %c0_i32_0 : i32, i32
  }
  func.func @transform_3(%arg0: i32, %arg1: i32) -> (i32, i32, i32) {
    %c0_i32 = arith.constant 0 : i32
    %c0_i32_0 = arith.constant 0 : i32
    return %arg0, %arg1, %c0_i32 : i32, i32, i32
  }
  func.func @transform_4(%arg0: i32, %arg1: i32) -> (i32, i32, i32, i32) {
    %c0_i32 = arith.constant 0 : i32
    %c0_i32_0 = arith.constant 0 : i32
    %c0_i32_1 = arith.constant 0 : i32
    return %arg0, %arg1, %c0_i32, %c0_i32_0 : i32, i32, i32, i32
  }
}

</mosaic_0001>

<bundles_post_ra>
// kernel: forward.5
= control target key start
LH: loop header
LB: loop body
LE: loop exit
PB: predicated region body
PF: predicated region fallthrough
CT: control target
= control target key end

     0   :  { %vm323_vm0 = vcmask 392192   ;;  %s1177_s1 = inlined_call_operand.vmem [shape: bf16[304,128], index: 1, kind: input, shape index: {}]   ;;  %s1178_s0 = inlined_call_operand.vmem [shape: bf16[128,304], index: 0, kind: input, shape index: {}]   ;;  %s1179_s2 = inlined_call_operand.vmem [shape: f32[1,128], index: 2, kind: input, shape index: {}]   ;;  %s1180_s3 = inlined_call_operand.vmem [shape: bf16[128,128], index: 3, kind: output, shape index: {}]  }
   0x1   :  { %v790_v0 = vld [vmem:[%s1177_s1 + $0x38] sm:$0xff]  ;;  %v900_v2 = vld [vmem:[%s1177_s1 + $0x90] sm:$0xff]  ;;  %v913_v5 = vld [vmem:[%s1177_s1 + $0x88] sm:$0xff] }
   0x2   :  { %v895_v1 = vld [vmem:[%s1177_s1 + $0x78] sm:$0xff]  ;;  %348 = vmatpush.bf16.msra.mxu0 %v790_v0  ;;  %849 = vmatpush.bf16.msra.mxu3 %v790_v0  ;;  %v789_v3 = vld [vmem:[%s1177_s1 + $0x30] sm:$0xff]  ;;  %v788_v6 = vld [vmem:[%s1177_s1 + $0x28] sm:$0xff] }
   0x3   :  { %397 = vmatpush.bf16.msra.mxu1 %v895_v1  ;;  %451 = vmatpush.bf16.msra.mxu2 %v900_v2  ;;  %v797_v4 = vld [vmem:[%s1177_s1 + $0x70] sm:$0xff]  ;;  %v796_v7 = vld [vmem:[%s1177_s1 + $0x68] sm:$0xff]  ;;  %v925_v8 = vld [vmem:[%s1177_s1 + $0x80] sm:$0xff] }
   0x4   :  { %v589_v9 = vld [vmem:[%s1178_s0 + $0x8] sm:$0xf]  ;;  %v761_v10 = vld [vmem:[%s1178_s0 + $0x10] sm:$0xf0]  ;;  %v787_v12 = vld [vmem:[%s1177_s1 + $0x20] sm:$0xff] }
   0x5   :  { %v590_v11 = vor.u32 %v761_v10, %v589_v9  ;;  %v795_v13 = vld [vmem:[%s1177_s1 + $0x60] sm:$0xff]  ;;  %v786_v14 = vld [vmem:[%s1177_s1 + $0x18] sm:$0xff]  ;;  %v785_v16 = vld [vmem:[%s1177_s1 + $0x10] sm:$0xff] }
   0x6   :  { %349 = vmatpush.bf16.msra.mxu0 %v789_v3  ;;  %850 = vmatpush.bf16.msra.mxu3 %v789_v3  ;;  %v794_v15 = vld [vmem:[%s1177_s1 + $0x58] sm:$0xff]  ;;  %v793_v17 = vld [vmem:[%s1177_s1 + $0x50] sm:$0xff]  ;;  %v784_v18 = vld [vmem:[%s1177_s1 + $0x8] sm:$0xff] }
   0x7   :  { %398 = vmatpush.bf16.msra.mxu1 %v797_v4  ;;  %452 = vmatpush.bf16.msra.mxu2 %v913_v5  ;;  %v792_v19 = vld [vmem:[%s1177_s1 + $0x48] sm:$0xff]  ;;  %v601_v20 = vld [vmem:[%s1178_s0 + $0x20] sm:$0xf]  ;;  %v653_v27 = vld [vmem:[%s1178_s0 + $0x90] sm:$0xf] }
   0x8   :  { %v764_v21 = vld [vmem:[%s1178_s0 + $0x28] sm:$0xf0]  ;;  %v783_v22 = vld [vmem:[%s1177_s1] sm:$0xff]  ;;  %v778_v28 = vld [vmem:[%s1178_s0 + $0x98] sm:$0xf0] }
   0x9   :  { %v791_v23 = vld [vmem:[%s1177_s1 + $0x40] sm:$0xff]  ;;  %v602_v25 = vor.u32 %v764_v21, %v601_v20  ;;  %v760_v26 = vld [vmem:[%s1178_s0 + $0x8] sm:$0xf0]  ;;  %v583_v30 = vld [vmem:[%s1178_s0 + $0xc] sm:$0xf0]  ;;  %v654_v32 = vor.u32 %v778_v28, %v653_v27 }
   0xa   :  { %350 = vmatpush.bf16.msra.mxu0 %v788_v6  ;;  %851 = vmatpush.bf16.msra.mxu3 %v788_v6  ;;  %v581_v24 = vld [vmem:[%s1178_s0] sm:$0xf]  ;;  %v759_v29 = vld [vmem:[%s1178_s0 + $0x4] sm:$0xf]  ;;  %v613_v34 = vld [vmem:[%s1178_s0 + $0x38] sm:$0xf] }
   0xb   :  { %399 = vmatpush.bf16.msra.mxu1 %v796_v7  ;;  %453 = vmatpush.bf16.msra.mxu2 %v925_v8  ;;  %v582_v31 = vor.u32 %v760_v26, %v581_v24  ;;  %v586_v33 = vor.u32 %v759_v29, %v583_v30  ;;  %v767_v35 = vld [vmem:[%s1178_s0 + $0x40] sm:$0xf0]  ;;  %v593_v37 = vld [vmem:[%s1178_s0 + $0x18] sm:$0xf]  ;;  %v665_v39 = vld [vmem:[%s1178_s0 + $0xa8] sm:$0xf] }
   0xc   :  { %v614_v36 = vor.u32 %v767_v35, %v613_v34  ;;  %v763_v38 = vld [vmem:[%s1178_s0 + $0x20] sm:$0xf0]  ;;  %v781_v40 = vld [vmem:[%s1178_s0 + $0xb0] sm:$0xf0]  ;;  %v762_v41 = vld [vmem:[%s1178_s0 + $0x1c] sm:$0xf] }
   0xd   :  { %v595_v42 = vld [vmem:[%s1178_s0 + $0x24] sm:$0xf0]  ;;  %v594_v43 = vor.u32 %v763_v38, %v593_v37  ;;  %v666_v44 = vor.u32 %v781_v40, %v665_v39  ;;  %v625_v46 = vld [vmem:[%s1178_s0 + $0x50] sm:$0xf]  ;;  %v770_v47 = vld [vmem:[%s1178_s0 + $0x58] sm:$0xf0] }
   0xe   :  { %751 = vmatmul.msk.bf16.vlgmr.msra.gmra.mxu2 %vm323_vm0, %v590_v11  ;;  %351 = vmatpush.bf16.msra.mxu0 %v787_v12  ;;  %v598_v45 = vor.u32 %v762_v41, %v595_v42  ;;  %v626_v48 = vor.u32 %v770_v47, %v625_v46  ;;  %v605_v49 = vld [vmem:[%s1178_s0 + $0x30] sm:$0xf]  ;;  %v766_v50 = vld [vmem:[%s1178_s0 + $0x38] sm:$0xf0]  ;;  %v765_v51 = vld [vmem:[%s1178_s0 + $0x34] sm:$0xf] }
   0xf   :  { %852 = vmatpush.bf16.msra.mxu3 %v787_v12  ;;  %400 = vmatpush.bf16.msra.mxu1 %v795_v13  ;;  %v607_v52 = vld [vmem:[%s1178_s0 + $0x3c] sm:$0xf0]  ;;  %v777_v53 = vld [vmem:[%s1178_s0 + $0x94] sm:$0xf]  ;;  %v606_v55 = vor.u32 %v766_v50, %v605_v49  ;;  %v637_v58 = vld [vmem:[%s1178_s0 + $0x68] sm:$0xf] }
  0x10   :  { %v655_v54 = vld [vmem:[%s1178_s0 + $0x9c] sm:$0xf0]  ;;  %v610_v56 = vor.u32 %v765_v51, %v607_v52  ;;  %v773_v59 = vld [vmem:[%s1178_s0 + $0x70] sm:$0xf0]  ;;  %v617_v61 = vld [vmem:[%s1178_s0 + $0x48] sm:$0xf] }
  0x11   :  { %v658_v57 = vor.u32 %v777_v53, %v655_v54  ;;  %v638_v60 = vor.u32 %v773_v59, %v637_v58  ;;  %v769_v62 = vld [vmem:[%s1178_s0 + $0x50] sm:$0xf0]  ;;  %v768_v63 = vld [vmem:[%s1178_s0 + $0x4c] sm:$0xf]  ;;  %v619_v0 = vld [vmem:[%s1178_s0 + $0x54] sm:$0xf0] }
  0x12   :  { %352 = vmatpush.bf16.msra.mxu0 %v786_v14  ;;  %v618_v3 = vor.u32 %v769_v62, %v617_v61  ;;  %v649_v6 = vld [vmem:[%s1178_s0 + $0x80] sm:$0xf]  ;;  %v772_v10 = vld [vmem:[%s1178_s0 + $0x68] sm:$0xf0]  ;;  %v771_v11 = vld [vmem:[%s1178_s0 + $0x64] sm:$0xf] }
  0x13   :  { %853 = vmatpush.bf16.msra.mxu3 %v786_v14  ;;  %401 = vmatpush.bf16.msra.mxu1 %v794_v15  ;;  %v629_v9 = vld [vmem:[%s1178_s0 + $0x60] sm:$0xf]  ;;  %v631_v12 = vld [vmem:[%s1178_s0 + $0x6c] sm:$0xf0]  ;;  %v782_v14 = vld [vmem:[%s1178_s0 + $0xb8] sm:$0xf0] }
  0x14   :  { %v641_v21 = vld [vmem:[%s1178_s0 + $0x78] sm:$0xf]  ;;  %v643_v24 = vld [vmem:[%s1178_s0 + $0x84] sm:$0xf0]  ;;  %v1117_v29 = vld [vmem:[%s1179_s2] ss:$0 sm:$0xff] }
  0x16   :  { %353 = vmatpush.bf16.msra.mxu0 %v785_v16 }
  0x17   :  { %854 = vmatpush.bf16.msra.mxu3 %v785_v16  ;;  %402 = vmatpush.bf16.msra.mxu1 %v793_v17  ;;  %v634_v16 = vor.u32 %v771_v11, %v631_v12 }
  0x1a   :  { %354 = vmatpush.bf16.msra.mxu0 %v784_v18 }
  0x1b   :  { %855 = vmatpush.bf16.msra.mxu3 %v784_v18  ;;  %403 = vmatpush.bf16.msra.mxu1 %v792_v19  ;;  %v661_v18 = vld [vmem:[%s1178_s0 + $0x98] sm:$0xf] }
  0x1e   :  { %752 = vmatmul.msk.bf16.gmra.mxu2 %vm323_vm0, %v602_v25  ;;  %355 = vmatpush.bf16.msra.mxu0 %v783_v22 }
  0x1f   :  { %856 = vmatpush.bf16.msra.mxu3 %v783_v22  ;;  %404 = vmatpush.bf16.msra.mxu1 %v791_v23  ;;  %v775_v22 = vld [vmem:[%s1178_s0 + $0x80] sm:$0xf0] }
  0x20   :  { %v642_v25 = vor.u32 %v775_v22, %v641_v21 }
  0x21   :  { %356 = vmatmul.bf16.vlgmr.msra.gmra.mxu0 %v582_v31 }
  0x22   :  { %386 = vmatmul.bf16.vlgmr.msra.gmra.mxu3 %v654_v32  ;;  %405 = vmatmul.bf16.vlgmr.msra.gmra.mxu1 %v586_v33 }
  0x23   :  { %857 = vmatpush.bf16.msrb.mxu3 %v895_v1  ;;  %v780_v1 = vld [vmem:[%s1178_s0 + $0xac] sm:$0xf] }
  0x27   :  { %858 = vmatpush.bf16.msrb.mxu3 %v797_v4  ;;  %v622_v4 = vor.u32 %v768_v63, %v619_v0 }
  0x2b   :  { %859 = vmatpush.bf16.msrb.mxu3 %v796_v7  ;;  %v776_v7 = vld [vmem:[%s1178_s0 + $0x88] sm:$0xf0] }
  0x2e   :  { %753 = vmatmul.msk.bf16.gmra.mxu2 %vm323_vm0, %v614_v36 }
  0x2f   :  { %860 = vmatpush.bf16.msrb.mxu3 %v795_v13  ;;  %v673_v13 = vld [vmem:[%s1178_s0 + $0xb0] sm:$0xf] }
  0x31   :  { %361 = vmatmul.bf16.gmra.mxu0 %v594_v43 }
  0x32   :  { %391 = vmatmul.bf16.gmra.mxu3 %v666_v44  ;;  %410 = vmatmul.bf16.gmra.mxu1 %v598_v45 }
  0x33   :  { %861 = vmatpush.bf16.msrb.mxu3 %v794_v15  ;;  %v630_v15 = vor.u32 %v772_v10, %v629_v9 }
  0x37   :  { %862 = vmatpush.bf16.msrb.mxu3 %v793_v17  ;;  %v674_v17 = vor.u32 %v782_v14, %v673_v13 }
  0x3b   :  { %863 = vmatpush.bf16.msrb.mxu3 %v792_v19  ;;  %v779_v19 = vld [vmem:[%s1178_s0 + $0xa0] sm:$0xf0] }
  0x3c   :  { %v662_v20 = vor.u32 %v779_v19, %v661_v18 }
  0x3e   :  { %754 = vmatmul.msk.bf16.gmra.mxu2 %vm323_vm0, %v626_v48 }
  0x3f   :  { %864 = vmatpush.bf16.msrb.mxu3 %v791_v23  ;;  %v774_v23 = vld [vmem:[%s1178_s0 + $0x7c] sm:$0xf] }
  0x40   :  { %v646_v26 = vor.u32 %v774_v23, %v643_v24 }
  0x41   :  { %366 = vmatmul.bf16.gmra.mxu0 %v606_v55 }
  0x42   :  { %415 = vmatmul.bf16.gmra.mxu1 %v610_v56  ;;  %435 = vmatmul.bf16.vlgmr.msrb.gmra.mxu3 %v658_v57 }
  0x43   :  { %865 = vmatpush.bf16.msra.mxu3 %v900_v2  ;;  %v667_v2 = vld [vmem:[%s1178_s0 + $0xb4] sm:$0xf0] }
  0x47   :  { %866 = vmatpush.bf16.msra.mxu3 %v913_v5  ;;  %v670_v5 = vor.u32 %v780_v1, %v667_v2 }
  0x4b   :  { %867 = vmatpush.bf16.msra.mxu3 %v925_v8  ;;  %v650_v8 = vor.u32 %v776_v7, %v649_v6 }
  0x4e   :  { %755 = vmatmul.msk.bf16.gmra.mxu2 %vm323_vm0, %v638_v60 }
  0x51   :  { %371 = vmatmul.bf16.gmra.mxu0 %v618_v3 }
  0x52   :  { %420 = vmatmul.bf16.gmra.mxu1 %v622_v4  ;;  %440 = vmatmul.bf16.gmra.mxu3 %v670_v5 }
  0x5e   :  { %756 = vmatmul.msk.bf16.gmra.mxu2 %vm323_vm0, %v650_v8 }
  0x61   :  { %376 = vmatmul.bf16.gmra.mxu0 %v630_v15 }
  0x62   :  { %425 = vmatmul.bf16.gmra.mxu1 %v634_v16  ;;  %758 = vmatmul.msk.bf16.vlgmr.msra.gmra.mxu3 %vm323_vm0, %v674_v17 }
  0x6e   :  { %757 = vmatmul.msk.bf16.gmra.mxu2 %vm323_vm0, %v662_v20 }
  0x71   :  { %381 = vmatmul.bf16.gmra.mxu0 %v642_v25 }
  0x72   :  { %430 = vmatmul.bf16.gmra.mxu1 %v646_v26 }
  0x91   :  { %v455_v27 = vpop.f32.mrf.mxu2 }
  0x99   :  { %v457_v28 = vpop.f32.mrf.mxu2 }
  0x9e   :  { %v357_v30 = vpop.f32.mrf.mxu0 }
  0x9f   :  { %v358_v31 = vadd.f32 %v1117_v29, %v357_v30  ;;  %v406_v32 = vpop.f32.mrf.mxu1 }
  0xa1   :  { %v460_v33 = vpop.f32.mrf.mxu2  ;;  %v407_v34 = vadd.f32 %v406_v32, %v358_v31 }
  0xa3   :  { %v456_v37 = vadd.f32 %v455_v27, %v407_v34 }
  0xa5   :  { %v1120_v35 = vpop.f32.mrf.mxu3  ;;  %v511_v42 = vmul.f32 0.2, %v456_v37  ;;  %vm495_vm1 = vcmp.ge.f32.partialorder %v456_v37, 0.0 }
  0xa6   :  { %v359_v36 = vpop.f32.mrf.mxu0 }
  0xa7   :  { %v360_v38 = vadd.f32 %v1117_v29, %v359_v36  ;;  %v408_v39 = vpop.f32.mrf.mxu1  ;;  %v527_v47 = vsel %vm495_vm1, %v456_v37, %v511_v42 }
  0xa9   :  { %v409_v40 = vadd.f32 %v408_v39, %v360_v38  ;;  %v462_v41 = vpop.f32.mrf.mxu2 }
  0xab   :  { %v458_v43 = vadd.f32 %v457_v28, %v409_v40 }
  0xad   :  { %vm496_vm2 = vcmp.ge.f32.partialorder %v458_v43, 0.0  ;;  %v512_v44 = vmul.f32 0.2, %v458_v43  ;;  %v1123_v45 = vpop.f32.mrf.mxu3 }
  0xae   :  { %v362_v46 = vpop.f32.mrf.mxu0 }
  0xaf   :  { %v528_v48 = vsel %vm496_vm2, %v458_v43, %v512_v44  ;;  %v363_v49 = vadd.f32 %v1117_v29, %v362_v46  ;;  %v411_v50 = vpop.f32.mrf.mxu1 }
  0xb0   :  { %v805_v51 = vpack.c.bf16 %v528_v48, %v527_v47 }
  0xb1   :  { %v465_v52 = vpop.f32.mrf.mxu2  ;;  %v412_v53 = vadd.f32 %v411_v50, %v363_v49 }
  0xb2   :  { %806 = vst [vmem:[%s1180_s3] sm:$0xff] %v805_v51  }
  0xb3   :  { %v461_v56 = vadd.f32 %v460_v33, %v412_v53 }
  0xb5   :  { %v1129_v54 = vpop.f32.mrf.mxu3  ;;  %v513_v61 = vmul.f32 0.2, %v461_v56  ;;  %vm497_vm3 = vcmp.ge.f32.partialorder %v461_v56, 0.0 }
  0xb6   :  { %v364_v55 = vpop.f32.mrf.mxu0  ;;  %v393_v51 = vadd.f32 %v1117_v29, %v1129_v54 }
  0xb7   :  { %v365_v57 = vadd.f32 %v1117_v29, %v364_v55  ;;  %v413_v58 = vpop.f32.mrf.mxu1  ;;  %v529_v2 = vsel %vm497_vm3, %v461_v56, %v513_v61 }
  0xb9   :  { %v414_v59 = vadd.f32 %v413_v58, %v365_v57  ;;  %v467_v60 = vpop.f32.mrf.mxu2 }
  0xbb   :  { %v463_v62 = vadd.f32 %v462_v41, %v414_v59 }
  0xbd   :  { %vm498_vm4 = vcmp.ge.f32.partialorder %v463_v62, 0.0  ;;  %v514_v63 = vmul.f32 0.2, %v463_v62  ;;  %v1132_v0 = vpop.f32.mrf.mxu3 }
  0xbe   :  { %v367_v1 = vpop.f32.mrf.mxu0 }
  0xbf   :  { %v530_v3 = vsel %vm498_vm4, %v463_v62, %v514_v63  ;;  %v368_v4 = vadd.f32 %v1117_v29, %v367_v1  ;;  %v416_v5 = vpop.f32.mrf.mxu1 }
  0xc0   :  { %v810_v6 = vpack.c.bf16 %v530_v3, %v529_v2 }
  0xc1   :  { %v470_v7 = vpop.f32.mrf.mxu2  ;;  %v417_v8 = vadd.f32 %v416_v5, %v368_v4 }
  0xc2   :  { %842 = vst [vmem:[%s1180_s3 + $0x8] sm:$0xff] %v810_v6  }
  0xc3   :  { %v466_v11 = vadd.f32 %v465_v52, %v417_v8 }
  0xc5   :  { %v1138_v9 = vpop.f32.mrf.mxu3  ;;  %v515_v16 = vmul.f32 0.2, %v466_v11  ;;  %vm499_vm5 = vcmp.ge.f32.partialorder %v466_v11, 0.0 }
  0xc6   :  { %v369_v10 = vpop.f32.mrf.mxu0 }
  0xc7   :  { %v370_v12 = vadd.f32 %v1117_v29, %v369_v10  ;;  %v418_v13 = vpop.f32.mrf.mxu1  ;;  %v531_v21 = vsel %vm499_vm5, %v466_v11, %v515_v16 }
  0xc9   :  { %v419_v14 = vadd.f32 %v418_v13, %v370_v12  ;;  %v472_v15 = vpop.f32.mrf.mxu2  ;;  %v388_v13 = vadd.f32 %v1117_v29, %v1120_v35 }
  0xcb   :  { %v468_v17 = vadd.f32 %v467_v60, %v419_v14  ;;  %v395_v60 = vadd.f32 %v1117_v29, %v1132_v0 }
  0xcd   :  { %vm500_vm6 = vcmp.ge.f32.partialorder %v468_v17, 0.0  ;;  %v516_v18 = vmul.f32 0.2, %v468_v17  ;;  %v1141_v19 = vpop.f32.mrf.mxu3 }
  0xce   :  { %v372_v20 = vpop.f32.mrf.mxu0 }
  0xcf   :  { %v532_v22 = vsel %vm500_vm6, %v468_v17, %v516_v18  ;;  %v373_v23 = vadd.f32 %v1117_v29, %v372_v20  ;;  %v421_v24 = vpop.f32.mrf.mxu1  ;;  %v437_v18 = vadd.f32 %v1138_v9, %v388_v13  ;;  %v390_v20 = vadd.f32 %v1117_v29, %v1123_v45 }
  0xd0   :  { %v815_v25 = vpack.c.bf16 %v532_v22, %v531_v21 }
  0xd1   :  { %v475_v26 = vpop.f32.mrf.mxu2  ;;  %v422_v27 = vadd.f32 %v421_v24, %v373_v23  ;;  %v439_v24 = vadd.f32 %v1141_v19, %v390_v20 }
  0xd2   :  { %843 = vst [vmem:[%s1180_s3 + $0x10] sm:$0xff] %v815_v25  }
  0xd3   :  { %v471_v31 = vadd.f32 %v470_v7, %v422_v27 }
  0xd5   :  { %v441_v28 = vpop.f32.mrf.mxu3  ;;  %v517_v37 = vmul.f32 0.2, %v471_v31  ;;  %vm501_vm7 = vcmp.ge.f32.partialorder %v471_v31, 0.0 }
  0xd6   :  { %v374_v30 = vpop.f32.mrf.mxu0  ;;  %v442_v57 = vadd.f32 %v441_v28, %v393_v51 }
  0xd7   :  { %v375_v32 = vadd.f32 %v1117_v29, %v374_v30  ;;  %v423_v33 = vpop.f32.mrf.mxu1  ;;  %v533_v42 = vsel %vm501_vm7, %v471_v31, %v517_v37 }
  0xd9   :  { %v424_v34 = vadd.f32 %v423_v33, %v375_v32  ;;  %v477_v36 = vpop.f32.mrf.mxu2 }
  0xdb   :  { %v473_v38 = vadd.f32 %v472_v15, %v424_v34 }
  0xdd   :  { %vm502_vm8 = vcmp.ge.f32.partialorder %v473_v38, 0.0  ;;  %v518_v39 = vmul.f32 0.2, %v473_v38  ;;  %v443_v40 = vpop.f32.mrf.mxu3 }
  0xde   :  { %v377_v41 = vpop.f32.mrf.mxu0  ;;  %v444_v1 = vadd.f32 %v443_v40, %v395_v60 }
  0xdf   :  { %v534_v43 = vsel %vm502_vm8, %v473_v38, %v518_v39  ;;  %v378_v44 = vadd.f32 %v1117_v29, %v377_v41  ;;  %v426_v46 = vpop.f32.mrf.mxu1 }
  0xe0   :  { %v820_v47 = vpack.c.bf16 %v534_v43, %v533_v42 }
  0xe1   :  { %v480_v48 = vpop.f32.mrf.mxu2  ;;  %v427_v49 = vadd.f32 %v426_v46, %v378_v44 }
  0xe2   :  { %844 = vst [vmem:[%s1180_s3 + $0x18] sm:$0xff] %v820_v47  }
  0xe3   :  { %v476_v53 = vadd.f32 %v475_v26, %v427_v49 }
  0xe5   :  { %v490_v50 = vpop.f32.mrf.mxu3  ;;  %v519_v62 = vmul.f32 0.2, %v476_v53  ;;  %vm503_vm9 = vcmp.ge.f32.partialorder %v476_v53, 0.0 }
  0xe6   :  { %v379_v52 = vpop.f32.mrf.mxu0  ;;  %v491_v61 = vadd.f32 %v490_v50, %v442_v57 }
  0xe7   :  { %v380_v55 = vadd.f32 %v1117_v29, %v379_v52  ;;  %v428_v56 = vpop.f32.mrf.mxu1  ;;  %v535_v6 = vsel %vm503_vm9, %v476_v53, %v519_v62 }
  0xe8   :  { %v525_v54 = vmul.f32 0.2, %v491_v61  ;;  %vm509_vm11 = vcmp.ge.f32.partialorder %v491_v61, 0.0 }
  0xe9   :  { %v429_v58 = vadd.f32 %v428_v56, %v380_v55  ;;  %v482_v59 = vpop.f32.mrf.mxu2 }
  0xea   :  { %v541_v14 = vsel %vm509_vm11, %v491_v61, %v525_v54 }
  0xeb   :  { %v478_v63 = vadd.f32 %v477_v36, %v429_v58 }
  0xed   :  { %vm504_vm10 = vcmp.ge.f32.partialorder %v478_v63, 0.0  ;;  %v520_v2 = vmul.f32 0.2, %v478_v63  ;;  %v492_v3 = vpop.f32.mrf.mxu3 }
  0xee   :  { %v493_v4 = vadd.f32 %v492_v3, %v444_v1  ;;  %v382_v5 = vpop.f32.mrf.mxu0 }
  0xef   :  { %v536_v7 = vsel %vm504_vm10, %v478_v63, %v520_v2  ;;  %v383_v8 = vadd.f32 %v1117_v29, %v382_v5  ;;  %v431_v10 = vpop.f32.mrf.mxu1 }
  0xf0   :  { %v825_v11 = vpack.c.bf16 %v536_v7, %v535_v6  ;;  %vm510_vm12 = vcmp.ge.f32.partialorder %v493_v4, 0.0  ;;  %v526_v0 = vmul.f32 0.2, %v493_v4 }
  0xf1   :  { %v485_v12 = vpop.f32.mrf.mxu2  ;;  %v432_v17 = vadd.f32 %v431_v10, %v383_v8 }
  0xf2   :  { %845 = vst [vmem:[%s1180_s3 + $0x20] sm:$0xff] %v825_v11   ;;  %v542_v15 = vsel %vm510_vm12, %v493_v4, %v526_v0  ;;  %v486_v21 = vadd.f32 %v485_v12, %v437_v18 }
  0xf3   :  { %v840_v16 = vpack.c.bf16 %v542_v15, %v541_v14  ;;  %v481_v35 = vadd.f32 %v480_v48, %v432_v17 }
  0xf4   :  { %v523_v28 = vmul.f32 0.2, %v486_v21  ;;  %vm507_vm13 = vcmp.ge.f32.partialorder %v486_v21, 0.0 }
  0xf5   :  { %848 = vst [vmem:[%s1180_s3 + $0x38] sm:$0xff] %v840_v16   ;;  %v521_v9 = vmul.f32 0.2, %v481_v35  ;;  %vm505_vm14 = vcmp.ge.f32.partialorder %v481_v35, 0.0 }
  0xf6   :  { %v384_v22 = vpop.f32.mrf.mxu0  ;;  %v539_v33 = vsel %vm507_vm13, %v486_v21, %v523_v28 }
  0xf7   :  { %v385_v23 = vadd.f32 %v1117_v29, %v384_v22  ;;  %v433_v25 = vpop.f32.mrf.mxu1  ;;  %v537_v36 = vsel %vm505_vm14, %v481_v35, %v521_v9 }
  0xf9   :  { %v434_v26 = vadd.f32 %v433_v25, %v385_v23  ;;  %v487_v27 = vpop.f32.mrf.mxu2 }
  0xfa   :  { %v488_v30 = vadd.f32 %v487_v27, %v439_v24 }
  0xfb   :  { %v483_v31 = vadd.f32 %v482_v59, %v434_v26 }
  0xfc   :  { %vm508_vm15 = vcmp.ge.f32.partialorder %v488_v30, 0.0  ;;  %v524_v32 = vmul.f32 0.2, %v488_v30 }
  0xfd   :  { %vm506_vm0 = vcmp.ge.f32.partialorder %v483_v31, 0.0  ;;  %v522_v45 = vmul.f32 0.2, %v483_v31 }
  0xfe   :  { %v540_v34 = vsel %vm508_vm15, %v488_v30, %v524_v32 }
  0xff   :  { %v538_v37 = vsel %vm506_vm0, %v483_v31, %v522_v45  ;;  %v835_v29 = vpack.c.bf16 %v540_v34, %v539_v33 }
 0x100   :  { %v830_v38 = vpack.c.bf16 %v538_v37, %v537_v36 }
 0x101   :  { %847 = vst [vmem:[%s1180_s3 + $0x30] sm:$0xff] %v835_v29  }
 0x102   :  { %846 = vst [vmem:[%s1180_s3 + $0x28] sm:$0xff] %v830_v38  }

// kernel: forward.7
= control target key start
LH: loop header
LB: loop body
LE: loop exit
PB: predicated region body
PF: predicated region fallthrough
CT: control target
= control target key end

     0   :  { %s461_s1 = inlined_call_operand.vmem [shape: bf16[256,128], index: 1, kind: input, shape index: {}]   ;;  %s462_s2 = inlined_call_operand.vmem [shape: f32[1,128], index: 2, kind: input, shape index: {}]   ;;  %s463_s0 = inlined_call_operand.vmem [shape: bf16[32,256], index: 0, kind: input, shape index: {}]   ;;  %s464_s3 = inlined_call_operand.vmem [shape: bf16[32,128], index: 3, kind: output, shape index: {}]  }
   0x1   :  { %v323_v0 = vld [vmem:[%s461_s1 + $0x38] sm:$0xff]  ;;  %v322_v2 = vld [vmem:[%s461_s1 + $0x30] sm:$0xff]  ;;  %v321_v4 = vld [vmem:[%s461_s1 + $0x28] sm:$0xff] }
   0x2   :  { %v331_v1 = vld [vmem:[%s461_s1 + $0x78] sm:$0xff]  ;;  %170 = vmatpush.bf16.msra.mxu0 %v323_v0  ;;  %343 = vmatpush.bf16.msra.mxu2 %v323_v0  ;;  %v330_v3 = vld [vmem:[%s461_s1 + $0x70] sm:$0xff]  ;;  %v329_v5 = vld [vmem:[%s461_s1 + $0x68] sm:$0xff] }
   0x3   :  { %189 = vmatpush.bf16.msra.mxu1 %v331_v1  ;;  %351 = vmatpush.bf16.msra.mxu3 %v331_v1  ;;  %v320_v6 = vld [vmem:[%s461_s1 + $0x20] sm:$0xff]  ;;  %v319_v8 = vld [vmem:[%s461_s1 + $0x18] sm:$0xff]  ;;  %v318_v10 = vld [vmem:[%s461_s1 + $0x10] sm:$0xff] }
   0x4   :  { %v328_v7 = vld [vmem:[%s461_s1 + $0x60] sm:$0xff]  ;;  %v327_v9 = vld [vmem:[%s461_s1 + $0x58] sm:$0xff]  ;;  %v326_v11 = vld [vmem:[%s461_s1 + $0x50] sm:$0xff] }
   0x5   :  { %v317_v12 = vld [vmem:[%s461_s1 + $0x8] sm:$0xff]  ;;  %v316_v14 = vld [vmem:[%s461_s1] sm:$0xff]  ;;  %v242_v18 = vld [vmem:[%s463_s0 + $0x10] sm:$0xf] }
   0x6   :  { %171 = vmatpush.bf16.msra.mxu0 %v322_v2  ;;  %344 = vmatpush.bf16.msra.mxu2 %v322_v2  ;;  %v325_v13 = vld [vmem:[%s461_s1 + $0x48] sm:$0xff]  ;;  %v324_v15 = vld [vmem:[%s461_s1 + $0x40] sm:$0xff]  ;;  %v315_v19 = vld [vmem:[%s463_s0 + $0x14] sm:$0xf0] }
   0x7   :  { %190 = vmatpush.bf16.msra.mxu1 %v330_v3  ;;  %352 = vmatpush.bf16.msra.mxu3 %v330_v3  ;;  %v234_v16 = vld [vmem:[%s463_s0] sm:$0xf]  ;;  %v313_v17 = vld [vmem:[%s463_s0 + $0x4] sm:$0xf0]  ;;  %v312_v20 = vld [vmem:[%s463_s0 + $0x4] sm:$0xf]  ;;  %v243_v25 = vor.u32 %v315_v19, %v242_v18 }
   0x8   :  { %v236_v21 = vld [vmem:[%s463_s0 + $0x8] sm:$0xf0]  ;;  %v314_v22 = vld [vmem:[%s463_s0 + $0x14] sm:$0xf]  ;;  %v244_v23 = vld [vmem:[%s463_s0 + $0x18] sm:$0xf0]  ;;  %v235_v24 = vor.u32 %v313_v17, %v234_v16 }
   0x9   :  { %v239_v26 = vor.u32 %v312_v20, %v236_v21  ;;  %v247_v27 = vor.u32 %v314_v22, %v244_v23  ;;  %v359_v28 = vld [vmem:[%s462_s2] ss:$0 sm:$0xff] }
   0xa   :  { %172 = vmatpush.bf16.msra.mxu0 %v321_v4  ;;  %345 = vmatpush.bf16.msra.mxu2 %v321_v4 }
   0xb   :  { %191 = vmatpush.bf16.msra.mxu1 %v329_v5  ;;  %353 = vmatpush.bf16.msra.mxu3 %v329_v5 }
   0xe   :  { %173 = vmatpush.bf16.msra.mxu0 %v320_v6  ;;  %346 = vmatpush.bf16.msra.mxu2 %v320_v6 }
   0xf   :  { %192 = vmatpush.bf16.msra.mxu1 %v328_v7  ;;  %354 = vmatpush.bf16.msra.mxu3 %v328_v7 }
  0x12   :  { %174 = vmatpush.bf16.msra.mxu0 %v319_v8  ;;  %347 = vmatpush.bf16.msra.mxu2 %v319_v8 }
  0x13   :  { %193 = vmatpush.bf16.msra.mxu1 %v327_v9  ;;  %355 = vmatpush.bf16.msra.mxu3 %v327_v9 }
  0x16   :  { %175 = vmatpush.bf16.msra.mxu0 %v318_v10  ;;  %348 = vmatpush.bf16.msra.mxu2 %v318_v10 }
  0x17   :  { %194 = vmatpush.bf16.msra.mxu1 %v326_v11  ;;  %356 = vmatpush.bf16.msra.mxu3 %v326_v11 }
  0x1a   :  { %176 = vmatpush.bf16.msra.mxu0 %v317_v12  ;;  %349 = vmatpush.bf16.msra.mxu2 %v317_v12 }
  0x1b   :  { %195 = vmatpush.bf16.msra.mxu1 %v325_v13  ;;  %357 = vmatpush.bf16.msra.mxu3 %v325_v13 }
  0x1e   :  { %177 = vmatpush.bf16.msra.mxu0 %v316_v14  ;;  %350 = vmatpush.bf16.msra.mxu2 %v316_v14 }
  0x1f   :  { %196 = vmatpush.bf16.msra.mxu1 %v324_v15  ;;  %358 = vmatpush.bf16.msra.mxu3 %v324_v15 }
  0x21   :  { %178 = vmatmul.bf16.vlgmr.msra.gmra.mxu0 %v235_v24  ;;  %183 = vmatmul.bf16.vlgmr.msra.gmra.mxu2 %v243_v25 }
  0x22   :  { %197 = vmatmul.bf16.vlgmr.msra.gmra.mxu1 %v239_v26  ;;  %202 = vmatmul.bf16.vlgmr.msra.gmra.mxu3 %v247_v27 }
  0x9e   :  { %v179_v29 = vpop.f32.mrf.mxu0 }
  0x9f   :  { %v198_v30 = vpop.f32.mrf.mxu1  ;;  %v180_v31 = vadd.f32 %v359_v28, %v179_v29 }
  0xa1   :  { %v199_v33 = vadd.f32 %v198_v30, %v180_v31 }
  0xa3   :  { %v212_v39 = vmul.f32 0.2, %v199_v33  ;;  %vm208_vm0 = vcmp.ge.f32.partialorder %v199_v33, 0.0 }
  0xa4   :  { %v184_v32 = vpop.f32.mrf.mxu2 }
  0xa5   :  { %v203_v34 = vpop.f32.mrf.mxu3  ;;  %v185_v36 = vadd.f32 %v359_v28, %v184_v32  ;;  %v216_v44 = vsel %vm208_vm0, %v199_v33, %v212_v39 }
  0xa6   :  { %v181_v35 = vpop.f32.mrf.mxu0 }
  0xa7   :  { %v182_v37 = vadd.f32 %v359_v28, %v181_v35  ;;  %v200_v38 = vpop.f32.mrf.mxu1  ;;  %v204_v41 = vadd.f32 %v203_v34, %v185_v36 }
  0xa9   :  { %v201_v40 = vadd.f32 %v200_v38, %v182_v37  ;;  %v214_v49 = vmul.f32 0.2, %v204_v41  ;;  %vm210_vm2 = vcmp.ge.f32.partialorder %v204_v41, 0.0 }
  0xab   :  { %vm209_vm1 = vcmp.ge.f32.partialorder %v201_v40, 0.0  ;;  %v213_v42 = vmul.f32 0.2, %v201_v40  ;;  %v218_v52 = vsel %vm210_vm2, %v204_v41, %v214_v49 }
  0xac   :  { %v186_v43 = vpop.f32.mrf.mxu2 }
  0xad   :  { %v217_v45 = vsel %vm209_vm1, %v201_v40, %v213_v42  ;;  %v187_v46 = vadd.f32 %v359_v28, %v186_v43  ;;  %v205_v48 = vpop.f32.mrf.mxu3 }
  0xae   :  { %v335_v47 = vpack.c.bf16 %v217_v45, %v216_v44 }
  0xaf   :  { %v206_v50 = vadd.f32 %v205_v48, %v187_v46 }
  0xb0   :  { %336 = vst [vmem:[%s464_s3] sm:$0xff] %v335_v47  }
  0xb1   :  { %vm211_vm3 = vcmp.ge.f32.partialorder %v206_v50, 0.0  ;;  %v215_v51 = vmul.f32 0.2, %v206_v50 }
  0xb3   :  { %v219_v53 = vsel %vm211_vm3, %v206_v50, %v215_v51 }
  0xb4   :  { %v340_v54 = vpack.c.bf16 %v219_v53, %v218_v52 }
  0xb6   :  { %342 = vst [vmem:[%s464_s3 + $0x8] sm:$0xff] %v340_v54  }

// kernel: forward.8
= control target key start
LH: loop header
LB: loop body
LE: loop exit
PB: predicated region body
PF: predicated region fallthrough
CT: control target
= control target key end

     0   :  { %s700_s1 = inlined_call_operand.vmem [shape: bf16[512,128], index: 1, kind: input, shape index: {}]   ;;  %s701_s2 = inlined_call_operand.vmem [shape: f32[1,128], index: 2, kind: input, shape index: {}]   ;;  %s702_s0 = inlined_call_operand.vmem [shape: bf16[16,512], index: 0, kind: input, shape index: {}]   ;;  %s703_s3 = inlined_call_operand.vmem [shape: bf16[16,128], index: 3, kind: output, shape index: {}]  }
   0x1   :  { %v523_v0 = vld [vmem:[%s700_s1 + $0x38] sm:$0xff]  ;;  %v522_v4 = vld [vmem:[%s700_s1 + $0x30] sm:$0xff]  ;;  %v521_v8 = vld [vmem:[%s700_s1 + $0x28] sm:$0xff] }
   0x2   :  { %v531_v1 = vld [vmem:[%s700_s1 + $0x78] sm:$0xff]  ;;  %298 = vmatpush.bf16.msra.mxu0 %v523_v0  ;;  %v530_v5 = vld [vmem:[%s700_s1 + $0x70] sm:$0xff]  ;;  %v529_v9 = vld [vmem:[%s700_s1 + $0x68] sm:$0xff] }
   0x3   :  { %v539_v2 = vld [vmem:[%s700_s1 + $0xb8] sm:$0xff]  ;;  %312 = vmatpush.bf16.msra.mxu1 %v531_v1  ;;  %v538_v6 = vld [vmem:[%s700_s1 + $0xb0] sm:$0xff]  ;;  %v537_v10 = vld [vmem:[%s700_s1 + $0xa8] sm:$0xff] }
   0x4   :  { %v547_v3 = vld [vmem:[%s700_s1 + $0xf8] sm:$0xff]  ;;  %326 = vmatpush.bf16.msra.mxu2 %v539_v2  ;;  %v546_v7 = vld [vmem:[%s700_s1 + $0xf0] sm:$0xff]  ;;  %v545_v11 = vld [vmem:[%s700_s1 + $0xe8] sm:$0xff] }
   0x5   :  { %340 = vmatpush.bf16.msra.mxu3 %v547_v3  ;;  %v520_v12 = vld [vmem:[%s700_s1 + $0x20] sm:$0xff]  ;;  %v519_v16 = vld [vmem:[%s700_s1 + $0x18] sm:$0xff]  ;;  %v518_v20 = vld [vmem:[%s700_s1 + $0x10] sm:$0xff] }
   0x6   :  { %299 = vmatpush.bf16.msra.mxu0 %v522_v4  ;;  %v528_v13 = vld [vmem:[%s700_s1 + $0x60] sm:$0xff]  ;;  %v527_v17 = vld [vmem:[%s700_s1 + $0x58] sm:$0xff]  ;;  %v526_v21 = vld [vmem:[%s700_s1 + $0x50] sm:$0xff] }
   0x7   :  { %313 = vmatpush.bf16.msra.mxu1 %v530_v5  ;;  %v536_v14 = vld [vmem:[%s700_s1 + $0xa0] sm:$0xff]  ;;  %v535_v18 = vld [vmem:[%s700_s1 + $0x98] sm:$0xff]  ;;  %v534_v22 = vld [vmem:[%s700_s1 + $0x90] sm:$0xff] }
   0x8   :  { %327 = vmatpush.bf16.msra.mxu2 %v538_v6  ;;  %v544_v15 = vld [vmem:[%s700_s1 + $0xe0] sm:$0xff]  ;;  %v543_v19 = vld [vmem:[%s700_s1 + $0xd8] sm:$0xff]  ;;  %v542_v23 = vld [vmem:[%s700_s1 + $0xd0] sm:$0xff] }
   0x9   :  { %341 = vmatpush.bf16.msra.mxu3 %v546_v7  ;;  %v517_v24 = vld [vmem:[%s700_s1 + $0x8] sm:$0xff]  ;;  %v516_v28 = vld [vmem:[%s700_s1] sm:$0xff]  ;;  %v514_v33 = vld [vmem:[%s702_s0 + $0xc] sm:$0xf0] }
   0xa   :  { %300 = vmatpush.bf16.msra.mxu0 %v521_v8  ;;  %v525_v25 = vld [vmem:[%s700_s1 + $0x48] sm:$0xff]  ;;  %v524_v29 = vld [vmem:[%s700_s1 + $0x40] sm:$0xff]  ;;  %v372_v35 = vld [vmem:[%s702_s0 + $0x10] sm:$0xf0] }
   0xb   :  { %314 = vmatpush.bf16.msra.mxu1 %v529_v9  ;;  %v533_v26 = vld [vmem:[%s700_s1 + $0x88] sm:$0xff]  ;;  %v532_v30 = vld [vmem:[%s700_s1 + $0x80] sm:$0xff]  ;;  %v515_v37 = vld [vmem:[%s702_s0 + $0x14] sm:$0xf0] }
   0xc   :  { %328 = vmatpush.bf16.msra.mxu2 %v537_v10  ;;  %v541_v27 = vld [vmem:[%s700_s1 + $0xc8] sm:$0xff]  ;;  %v540_v31 = vld [vmem:[%s700_s1 + $0xc0] sm:$0xff]  ;;  %v380_v39 = vld [vmem:[%s702_s0 + $0x18] sm:$0xf0] }
   0xd   :  { %342 = vmatpush.bf16.msra.mxu3 %v545_v11  ;;  %v370_v32 = vld [vmem:[%s702_s0] sm:$0xf]  ;;  %v512_v34 = vld [vmem:[%s702_s0 + $0x4] sm:$0xf]  ;;  %v378_v36 = vld [vmem:[%s702_s0 + $0x8] sm:$0xf] }
   0xe   :  { %301 = vmatpush.bf16.msra.mxu0 %v520_v12  ;;  %v513_v38 = vld [vmem:[%s702_s0 + $0xc] sm:$0xf]  ;;  %v371_v40 = vor.u32 %v514_v33, %v370_v32  ;;  %v375_v41 = vor.u32 %v512_v34, %v372_v35  ;;  %v379_v42 = vor.u32 %v515_v37, %v378_v36  ;;  %v553_v44 = vld [vmem:[%s701_s2] ss:$0 sm:$0xff] }
   0xf   :  { %315 = vmatpush.bf16.msra.mxu1 %v528_v13  ;;  %v383_v43 = vor.u32 %v513_v38, %v380_v39 }
  0x10   :  { %329 = vmatpush.bf16.msra.mxu2 %v536_v14 }
  0x11   :  { %343 = vmatpush.bf16.msra.mxu3 %v544_v15 }
  0x12   :  { %302 = vmatpush.bf16.msra.mxu0 %v519_v16 }
  0x13   :  { %316 = vmatpush.bf16.msra.mxu1 %v527_v17 }
  0x14   :  { %330 = vmatpush.bf16.msra.mxu2 %v535_v18 }
  0x15   :  { %344 = vmatpush.bf16.msra.mxu3 %v543_v19 }
  0x16   :  { %303 = vmatpush.bf16.msra.mxu0 %v518_v20 }
  0x17   :  { %317 = vmatpush.bf16.msra.mxu1 %v526_v21 }
  0x18   :  { %331 = vmatpush.bf16.msra.mxu2 %v534_v22 }
  0x19   :  { %345 = vmatpush.bf16.msra.mxu3 %v542_v23 }
  0x1a   :  { %304 = vmatpush.bf16.msra.mxu0 %v517_v24 }
  0x1b   :  { %318 = vmatpush.bf16.msra.mxu1 %v525_v25 }
  0x1c   :  { %332 = vmatpush.bf16.msra.mxu2 %v533_v26 }
  0x1d   :  { %346 = vmatpush.bf16.msra.mxu3 %v541_v27 }
  0x1e   :  { %305 = vmatpush.bf16.msra.mxu0 %v516_v28 }
  0x1f   :  { %319 = vmatpush.bf16.msra.mxu1 %v524_v29 }
  0x20   :  { %333 = vmatpush.bf16.msra.mxu2 %v532_v30 }
  0x21   :  { %347 = vmatpush.bf16.msra.mxu3 %v540_v31  ;;  %306 = vmatmul.bf16.vlgmr.msra.gmra.mxu0 %v371_v40 }
  0x22   :  { %320 = vmatmul.bf16.vlgmr.msra.gmra.mxu1 %v375_v41 }
  0x23   :  { %334 = vmatmul.bf16.vlgmr.msra.gmra.mxu2 %v379_v42 }
  0x24   :  { %348 = vmatmul.bf16.vlgmr.msra.gmra.mxu3 %v383_v43 }
  0x9e   :  { %v307_v45 = vpop.f32.mrf.mxu0 }
  0x9f   :  { %v308_v46 = vadd.f32 %v553_v44, %v307_v45  ;;  %v321_v47 = vpop.f32.mrf.mxu1 }
  0xa1   :  { %v322_v48 = vadd.f32 %v321_v47, %v308_v46 }
  0xa6   :  { %v335_v49 = vpop.f32.mrf.mxu2  ;;  %v309_v51 = vpop.f32.mrf.mxu0 }
  0xa7   :  { %v349_v50 = vpop.f32.mrf.mxu3  ;;  %v336_v52 = vadd.f32 %v335_v49, %v322_v48  ;;  %v310_v53 = vadd.f32 %v553_v44, %v309_v51  ;;  %v323_v54 = vpop.f32.mrf.mxu1 }
  0xa9   :  { %v350_v55 = vadd.f32 %v349_v50, %v336_v52  ;;  %v324_v56 = vadd.f32 %v323_v54, %v310_v53 }
  0xab   :  { %v356_v60 = vmul.f32 0.2, %v350_v55  ;;  %vm354_vm0 = vcmp.ge.f32.partialorder %v350_v55, 0.0 }
  0xad   :  { %v358_v63 = vsel %vm354_vm0, %v350_v55, %v356_v60 }
  0xae   :  { %v337_v57 = vpop.f32.mrf.mxu2 }
  0xaf   :  { %v338_v58 = vadd.f32 %v337_v57, %v324_v56  ;;  %v351_v59 = vpop.f32.mrf.mxu3 }
  0xb1   :  { %v352_v61 = vadd.f32 %v351_v59, %v338_v58 }
  0xb3   :  { %vm355_vm1 = vcmp.ge.f32.partialorder %v352_v61, 0.0  ;;  %v357_v62 = vmul.f32 0.2, %v352_v61 }
  0xb5   :  { %v359_v0 = vsel %vm355_vm1, %v352_v61, %v357_v62 }
  0xb6   :  { %v551_v1 = vpack.c.bf16 %v359_v0, %v358_v63 }
  0xb8   :  { %552 = vst [vmem:[%s703_s3] sm:$0xff] %v551_v1  }

// kernel: forward.9
= control target key start
LH: loop header
LB: loop body
LE: loop exit
PB: predicated region body
PF: predicated region fallthrough
CT: control target
= control target key end

     0   :  { %s1332_s1 = inlined_call_operand.vmem [shape: bf16[1024,128], index: 1, kind: input, shape index: {}]   ;;  %s1333_s2 = inlined_call_operand.vmem [shape: f32[1,128], index: 2, kind: input, shape index: {}]   ;;  %s1334_s0 = inlined_call_operand.vmem [shape: bf16[16,1024], index: 0, kind: input, shape index: {}]   ;;  %s1335_s3 = inlined_call_operand.vmem [shape: f32[16,128], index: 3, kind: output, shape index: {}]  }
   0x1   :  { %v1005_v0 = vld [vmem:[%s1332_s1 + $0x38] sm:$0xff]  ;;  %v1004_v4 = vld [vmem:[%s1332_s1 + $0x30] sm:$0xff]  ;;  %v1003_v8 = vld [vmem:[%s1332_s1 + $0x28] sm:$0xff] }
   0x2   :  { %v1013_v1 = vld [vmem:[%s1332_s1 + $0x78] sm:$0xff]  ;;  %578 = vmatpush.bf16.msra.mxu0 %v1005_v0  ;;  %v1012_v5 = vld [vmem:[%s1332_s1 + $0x70] sm:$0xff]  ;;  %v1011_v9 = vld [vmem:[%s1332_s1 + $0x68] sm:$0xff] }
   0x3   :  { %v1021_v2 = vld [vmem:[%s1332_s1 + $0xb8] sm:$0xff]  ;;  %592 = vmatpush.bf16.msra.mxu1 %v1013_v1  ;;  %v1020_v6 = vld [vmem:[%s1332_s1 + $0xb0] sm:$0xff]  ;;  %v1019_v10 = vld [vmem:[%s1332_s1 + $0xa8] sm:$0xff] }
   0x4   :  { %v1029_v3 = vld [vmem:[%s1332_s1 + $0xf8] sm:$0xff]  ;;  %606 = vmatpush.bf16.msra.mxu2 %v1021_v2  ;;  %v1028_v7 = vld [vmem:[%s1332_s1 + $0xf0] sm:$0xff]  ;;  %v1027_v11 = vld [vmem:[%s1332_s1 + $0xe8] sm:$0xff] }
   0x5   :  { %620 = vmatpush.bf16.msra.mxu3 %v1029_v3  ;;  %v1002_v12 = vld [vmem:[%s1332_s1 + $0x20] sm:$0xff]  ;;  %v1001_v16 = vld [vmem:[%s1332_s1 + $0x18] sm:$0xff]  ;;  %v1000_v20 = vld [vmem:[%s1332_s1 + $0x10] sm:$0xff] }
   0x6   :  { %579 = vmatpush.bf16.msra.mxu0 %v1004_v4  ;;  %v1010_v13 = vld [vmem:[%s1332_s1 + $0x60] sm:$0xff]  ;;  %v1009_v17 = vld [vmem:[%s1332_s1 + $0x58] sm:$0xff]  ;;  %v1008_v21 = vld [vmem:[%s1332_s1 + $0x50] sm:$0xff] }
   0x7   :  { %593 = vmatpush.bf16.msra.mxu1 %v1012_v5  ;;  %v1018_v14 = vld [vmem:[%s1332_s1 + $0xa0] sm:$0xff]  ;;  %v1017_v18 = vld [vmem:[%s1332_s1 + $0x98] sm:$0xff]  ;;  %v1016_v22 = vld [vmem:[%s1332_s1 + $0x90] sm:$0xff] }
   0x8   :  { %607 = vmatpush.bf16.msra.mxu2 %v1020_v6  ;;  %v1026_v15 = vld [vmem:[%s1332_s1 + $0xe0] sm:$0xff]  ;;  %v1025_v19 = vld [vmem:[%s1332_s1 + $0xd8] sm:$0xff]  ;;  %v1024_v23 = vld [vmem:[%s1332_s1 + $0xd0] sm:$0xff] }
   0x9   :  { %621 = vmatpush.bf16.msra.mxu3 %v1028_v7  ;;  %v999_v24 = vld [vmem:[%s1332_s1 + $0x8] sm:$0xff]  ;;  %v998_v28 = vld [vmem:[%s1332_s1] sm:$0xff]  ;;  %v1037_v32 = vld [vmem:[%s1332_s1 + $0x138] sm:$0xff] }
   0xa   :  { %580 = vmatpush.bf16.msra.mxu0 %v1003_v8  ;;  %v1007_v25 = vld [vmem:[%s1332_s1 + $0x48] sm:$0xff]  ;;  %v1006_v29 = vld [vmem:[%s1332_s1 + $0x40] sm:$0xff]  ;;  %v1045_v33 = vld [vmem:[%s1332_s1 + $0x178] sm:$0xff] }
   0xb   :  { %594 = vmatpush.bf16.msra.mxu1 %v1011_v9  ;;  %v1015_v26 = vld [vmem:[%s1332_s1 + $0x88] sm:$0xff]  ;;  %v1014_v30 = vld [vmem:[%s1332_s1 + $0x80] sm:$0xff]  ;;  %v1053_v42 = vld [vmem:[%s1332_s1 + $0x1b8] sm:$0xff] }
   0xc   :  { %608 = vmatpush.bf16.msra.mxu2 %v1019_v10  ;;  %v1023_v27 = vld [vmem:[%s1332_s1 + $0xc8] sm:$0xff]  ;;  %v1022_v31 = vld [vmem:[%s1332_s1 + $0xc0] sm:$0xff]  ;;  %v1061_v43 = vld [vmem:[%s1332_s1 + $0x1f8] sm:$0xff] }
   0xd   :  { %622 = vmatpush.bf16.msra.mxu3 %v1027_v11  ;;  %v712_v34 = vld [vmem:[%s1334_s0 + $0x8] sm:$0xf]  ;;  %v704_v36 = vld [vmem:[%s1334_s0] sm:$0xf]  ;;  %v991_v38 = vld [vmem:[%s1334_s0 + $0xc] sm:$0xf] }
   0xe   :  { %581 = vmatpush.bf16.msra.mxu0 %v1002_v12  ;;  %v995_v35 = vld [vmem:[%s1334_s0 + $0x24] sm:$0xf0]  ;;  %v994_v37 = vld [vmem:[%s1334_s0 + $0x1c] sm:$0xf0]  ;;  %v714_v39 = vld [vmem:[%s1334_s0 + $0x28] sm:$0xf0] }
   0xf   :  { %595 = vmatpush.bf16.msra.mxu1 %v1010_v13  ;;  %v990_v40 = vld [vmem:[%s1334_s0 + $0x4] sm:$0xf]  ;;  %v713_v44 = vor.u32 %v995_v35, %v712_v34  ;;  %v705_v45 = vor.u32 %v994_v37, %v704_v36  ;;  %v717_v46 = vor.u32 %v991_v38, %v714_v39  ;;  %v1036_v48 = vld [vmem:[%s1332_s1 + $0x130] sm:$0xff]  ;;  %v1035_v52 = vld [vmem:[%s1332_s1 + $0x128] sm:$0xff] }
  0x10   :  { %609 = vmatpush.bf16.msra.mxu2 %v1018_v14  ;;  %v706_v41 = vld [vmem:[%s1334_s0 + $0x20] sm:$0xf0]  ;;  %v1044_v49 = vld [vmem:[%s1332_s1 + $0x170] sm:$0xff]  ;;  %v1043_v53 = vld [vmem:[%s1332_s1 + $0x168] sm:$0xff] }
  0x11   :  { %623 = vmatpush.bf16.msra.mxu3 %v1026_v15  ;;  %v709_v47 = vor.u32 %v990_v40, %v706_v41  ;;  %v1052_v50 = vld [vmem:[%s1332_s1 + $0x1b0] sm:$0xff]  ;;  %v1051_v54 = vld [vmem:[%s1332_s1 + $0x1a8] sm:$0xff]  ;;  %v1034_v56 = vld [vmem:[%s1332_s1 + $0x120] sm:$0xff] }
  0x12   :  { %582 = vmatpush.bf16.msra.mxu0 %v1001_v16  ;;  %v1060_v51 = vld [vmem:[%s1332_s1 + $0x1f0] sm:$0xff]  ;;  %v1059_v55 = vld [vmem:[%s1332_s1 + $0x1e8] sm:$0xff]  ;;  %v1042_v57 = vld [vmem:[%s1332_s1 + $0x160] sm:$0xff] }
  0x13   :  { %596 = vmatpush.bf16.msra.mxu1 %v1009_v17  ;;  %v1050_v58 = vld [vmem:[%s1332_s1 + $0x1a0] sm:$0xff]  ;;  %v1033_v60 = vld [vmem:[%s1332_s1 + $0x118] sm:$0xff]  ;;  %v1032_v0 = vld [vmem:[%s1332_s1 + $0x110] sm:$0xff] }
  0x14   :  { %610 = vmatpush.bf16.msra.mxu2 %v1017_v18  ;;  %v1058_v59 = vld [vmem:[%s1332_s1 + $0x1e0] sm:$0xff]  ;;  %v1041_v61 = vld [vmem:[%s1332_s1 + $0x158] sm:$0xff]  ;;  %v1040_v1 = vld [vmem:[%s1332_s1 + $0x150] sm:$0xff] }
  0x15   :  { %624 = vmatpush.bf16.msra.mxu3 %v1025_v19  ;;  %v1049_v62 = vld [vmem:[%s1332_s1 + $0x198] sm:$0xff]  ;;  %v1048_v2 = vld [vmem:[%s1332_s1 + $0x190] sm:$0xff]  ;;  %v1031_v4 = vld [vmem:[%s1332_s1 + $0x108] sm:$0xff] }
  0x16   :  { %583 = vmatpush.bf16.msra.mxu0 %v1000_v20  ;;  %v1057_v63 = vld [vmem:[%s1332_s1 + $0x1d8] sm:$0xff]  ;;  %v1056_v3 = vld [vmem:[%s1332_s1 + $0x1d0] sm:$0xff]  ;;  %v1039_v5 = vld [vmem:[%s1332_s1 + $0x148] sm:$0xff] }
  0x17   :  { %597 = vmatpush.bf16.msra.mxu1 %v1008_v21  ;;  %v1047_v6 = vld [vmem:[%s1332_s1 + $0x188] sm:$0xff]  ;;  %v1030_v8 = vld [vmem:[%s1332_s1 + $0x100] sm:$0xff]  ;;  %v720_v12 = vld [vmem:[%s1334_s0 + $0x10] sm:$0xf] }
  0x18   :  { %611 = vmatpush.bf16.msra.mxu2 %v1016_v22  ;;  %v1055_v7 = vld [vmem:[%s1332_s1 + $0x1c8] sm:$0xff]  ;;  %v1038_v9 = vld [vmem:[%s1332_s1 + $0x140] sm:$0xff]  ;;  %v996_v13 = vld [vmem:[%s1334_s0 + $0x2c] sm:$0xf0] }
  0x19   :  { %625 = vmatpush.bf16.msra.mxu3 %v1024_v23  ;;  %v1046_v10 = vld [vmem:[%s1332_s1 + $0x180] sm:$0xff]  ;;  %v992_v14 = vld [vmem:[%s1334_s0 + $0x14] sm:$0xf]  ;;  %v728_v16 = vld [vmem:[%s1334_s0 + $0x18] sm:$0xf]  ;;  %v721_v20 = vor.u32 %v996_v13, %v720_v12 }
  0x1a   :  { %584 = vmatpush.bf16.msra.mxu0 %v999_v24  ;;  %v1054_v11 = vld [vmem:[%s1332_s1 + $0x1c0] sm:$0xff]  ;;  %v722_v15 = vld [vmem:[%s1334_s0 + $0x30] sm:$0xf0]  ;;  %v997_v17 = vld [vmem:[%s1334_s0 + $0x34] sm:$0xf0] }
  0x1b   :  { %598 = vmatpush.bf16.msra.mxu1 %v1007_v25  ;;  %v993_v18 = vld [vmem:[%s1334_s0 + $0x1c] sm:$0xf]  ;;  %v725_v21 = vor.u32 %v992_v14, %v722_v15  ;;  %v729_v22 = vor.u32 %v997_v17, %v728_v16  ;;  %v1062_v25 = vld [vmem:[%s1333_s2] ss:$0 sm:$0xff] }
  0x1c   :  { %612 = vmatpush.bf16.msra.mxu2 %v1015_v26  ;;  %v730_v19 = vld [vmem:[%s1334_s0 + $0x38] sm:$0xf0] }
  0x1d   :  { %626 = vmatpush.bf16.msra.mxu3 %v1023_v27  ;;  %v733_v23 = vor.u32 %v993_v18, %v730_v19 }
  0x1e   :  { %585 = vmatpush.bf16.msra.mxu0 %v998_v28 }
  0x1f   :  { %599 = vmatpush.bf16.msra.mxu1 %v1006_v29 }
  0x20   :  { %613 = vmatpush.bf16.msra.mxu2 %v1014_v30 }
  0x21   :  { %627 = vmatpush.bf16.msra.mxu3 %v1022_v31  ;;  %586 = vmatmul.bf16.vlgmr.msra.gmra.mxu0 %v705_v45 }
  0x22   :  { %634 = vmatpush.bf16.msrb.mxu0 %v1037_v32  ;;  %600 = vmatmul.bf16.vlgmr.msra.gmra.mxu1 %v709_v47 }
  0x23   :  { %648 = vmatpush.bf16.msrb.mxu1 %v1045_v33  ;;  %614 = vmatmul.bf16.vlgmr.msra.gmra.mxu2 %v713_v44 }
  0x24   :  { %662 = vmatpush.bf16.msrb.mxu2 %v1053_v42  ;;  %628 = vmatmul.bf16.vlgmr.msra.gmra.mxu3 %v717_v46 }
  0x25   :  { %676 = vmatpush.bf16.msrb.mxu3 %v1061_v43 }
  0x26   :  { %635 = vmatpush.bf16.msrb.mxu0 %v1036_v48 }
  0x27   :  { %649 = vmatpush.bf16.msrb.mxu1 %v1044_v49 }
  0x28   :  { %663 = vmatpush.bf16.msrb.mxu2 %v1052_v50 }
  0x29   :  { %677 = vmatpush.bf16.msrb.mxu3 %v1060_v51 }
  0x2a   :  { %636 = vmatpush.bf16.msrb.mxu0 %v1035_v52 }
  0x2b   :  { %650 = vmatpush.bf16.msrb.mxu1 %v1043_v53 }
  0x2c   :  { %664 = vmatpush.bf16.msrb.mxu2 %v1051_v54 }
  0x2d   :  { %678 = vmatpush.bf16.msrb.mxu3 %v1059_v55 }
  0x2e   :  { %637 = vmatpush.bf16.msrb.mxu0 %v1034_v56 }
  0x2f   :  { %651 = vmatpush.bf16.msrb.mxu1 %v1042_v57 }
  0x30   :  { %665 = vmatpush.bf16.msrb.mxu2 %v1050_v58 }
  0x31   :  { %679 = vmatpush.bf16.msrb.mxu3 %v1058_v59 }
  0x32   :  { %638 = vmatpush.bf16.msrb.mxu0 %v1033_v60 }
  0x33   :  { %652 = vmatpush.bf16.msrb.mxu1 %v1041_v61 }
  0x34   :  { %666 = vmatpush.bf16.msrb.mxu2 %v1049_v62 }
  0x35   :  { %680 = vmatpush.bf16.msrb.mxu3 %v1057_v63 }
  0x36   :  { %639 = vmatpush.bf16.msrb.mxu0 %v1032_v0 }
  0x37   :  { %653 = vmatpush.bf16.msrb.mxu1 %v1040_v1 }
  0x38   :  { %667 = vmatpush.bf16.msrb.mxu2 %v1048_v2 }
  0x39   :  { %681 = vmatpush.bf16.msrb.mxu3 %v1056_v3 }
  0x3a   :  { %640 = vmatpush.bf16.msrb.mxu0 %v1031_v4 }
  0x3b   :  { %654 = vmatpush.bf16.msrb.mxu1 %v1039_v5 }
  0x3c   :  { %668 = vmatpush.bf16.msrb.mxu2 %v1047_v6 }
  0x3d   :  { %682 = vmatpush.bf16.msrb.mxu3 %v1055_v7 }
  0x3e   :  { %641 = vmatpush.bf16.msrb.mxu0 %v1030_v8 }
  0x3f   :  { %655 = vmatpush.bf16.msrb.mxu1 %v1038_v9 }
  0x40   :  { %669 = vmatpush.bf16.msrb.mxu2 %v1046_v10 }
  0x41   :  { %683 = vmatpush.bf16.msrb.mxu3 %v1054_v11  ;;  %642 = vmatmul.bf16.vlgmr.msrb.gmra.mxu0 %v721_v20 }
  0x42   :  { %656 = vmatmul.bf16.vlgmr.msrb.gmra.mxu1 %v725_v21 }
  0x43   :  { %670 = vmatmul.bf16.vlgmr.msrb.gmra.mxu2 %v729_v22 }
  0x44   :  { %684 = vmatmul.bf16.vlgmr.msrb.gmra.mxu3 %v733_v23 }
  0x9e   :  { %v587_v24 = vpop.f32.mrf.mxu0 }
  0x9f   :  { %v601_v26 = vpop.f32.mrf.mxu1  ;;  %v588_v27 = vadd.f32 %v1062_v25, %v587_v24 }
  0xa1   :  { %v602_v30 = vadd.f32 %v601_v26, %v588_v27 }
  0xa6   :  { %v615_v28 = vpop.f32.mrf.mxu2  ;;  %v589_v31 = vpop.f32.mrf.mxu0 }
  0xa7   :  { %v629_v29 = vpop.f32.mrf.mxu3  ;;  %v603_v32 = vpop.f32.mrf.mxu1  ;;  %v616_v33 = vadd.f32 %v615_v28, %v602_v30  ;;  %v590_v34 = vadd.f32 %v1062_v25, %v589_v31 }
  0xa9   :  { %v630_v37 = vadd.f32 %v629_v29, %v616_v33  ;;  %v604_v38 = vadd.f32 %v603_v32, %v590_v34 }
  0xae   :  { %v617_v35 = vpop.f32.mrf.mxu2 }
  0xaf   :  { %v631_v36 = vpop.f32.mrf.mxu3  ;;  %v618_v42 = vadd.f32 %v617_v35, %v604_v38 }
  0xb1   :  { %v632_v46 = vadd.f32 %v631_v36, %v618_v42 }
  0xbe   :  { %v643_v39 = vpop.f32.mrf.mxu0 }
  0xbf   :  { %v644_v40 = vadd.f32 %v643_v39, %v630_v37  ;;  %v657_v41 = vpop.f32.mrf.mxu1 }
  0xc1   :  { %v658_v43 = vadd.f32 %v657_v41, %v644_v40 }
  0xc6   :  { %v671_v44 = vpop.f32.mrf.mxu2  ;;  %v645_v48 = vpop.f32.mrf.mxu0 }
  0xc7   :  { %v685_v45 = vpop.f32.mrf.mxu3  ;;  %v672_v47 = vadd.f32 %v671_v44, %v658_v43  ;;  %v646_v50 = vadd.f32 %v645_v48, %v632_v46  ;;  %v659_v52 = vpop.f32.mrf.mxu1 }
  0xc9   :  { %v686_v49 = vadd.f32 %v685_v45, %v672_v47  ;;  %v660_v54 = vadd.f32 %v659_v52, %v646_v50 }
  0xcb   :  { %vm690_vm0 = vcmp.ge.f32.partialorder %v686_v49, 0.0  ;;  %v692_v51 = vmul.f32 0.2, %v686_v49 }
  0xcd   :  { %v694_v53 = vsel %vm690_vm0, %v686_v49, %v692_v51 }
  0xce   :  { %696 = vst [vmem:[%s1335_s3] sm:$0xff] %v694_v53  ;;  %v673_v55 = vpop.f32.mrf.mxu2 }
  0xcf   :  { %v674_v56 = vadd.f32 %v673_v55, %v660_v54  ;;  %v687_v57 = vpop.f32.mrf.mxu3 }
  0xd1   :  { %v688_v58 = vadd.f32 %v687_v57, %v674_v56 }
  0xd3   :  { %vm691_vm1 = vcmp.ge.f32.partialorder %v688_v58, 0.0  ;;  %v693_v59 = vmul.f32 0.2, %v688_v58 }
  0xd5   :  { %v695_v60 = vsel %vm691_vm1, %v688_v58, %v693_v59 }
  0xd6   :  { %697 = vst [vmem:[%s1335_s3 + $0x8] sm:$0xff] %v695_v60 }

// kernel: forward.6
= control target key start
LH: loop header
LB: loop body
LE: loop exit
PB: predicated region body
PF: predicated region fallthrough
CT: control target
= control target key end

     0   :  { %s804_s15 = smov 0   ;;  %s806_s16 = smov 0   ;;  %s897_s0 = inlined_call_operand.vmem [shape: bf16[2,64,144], index: 0, kind: input, shape index: {}]   ;;  %s898_s1 = inlined_call_operand.vmem [shape: bf16[144,128], index: 1, kind: input, shape index: {}]   ;;  %s899_s2 = inlined_call_operand.vmem [shape: f32[1,128], index: 2, kind: input, shape index: {}]   ;;  %s900_s3 = inlined_call_operand.vmem [shape: bf16[2,64,128], index: 3, kind: input, shape index: {}]   ;;  %s901_s4 = inlined_call_operand.vmem [shape: f32[2,1,8,128], index: 4, kind: output, shape index: {}]  }
   0x1   :  { %s808_s17 = smov 0  }
   0x2 LB: > { %s26_s18 = sadd.s32 1, %s773_s16  ;;  %p603_p0 = scmp.ge.s32.totalorder %s777_s17, 1  ;;  %s777_s17 = sphi %s808_s17, %s14_s17   ;;  %s773_s16 = sphi %s806_s16, %s903_s16   ;;  %s769_s15 = sphi %s804_s15, %s902_s15  }
   0x3   : > { %p28_p1 = scmp.ge.s32.totalorder %s26_s18, 2  ;;  %p201_p2 = scmp.lt.s32.totalorder %s777_s17, 3 }
   0x5   : > { %s905_s18 = smov (%p28_p1, %s26_s18), 0  ;;  %p202_p3 = pnand %p603_p0, %p201_p2 }
   0x6   : > { %p244_p4 = scmp.lt.s32.totalorder (!%p202_p3), %s769_s15, 1 }
   0x7   : > { %205 = sbr.rel (%p202_p3) target bundleno = 223 (0xdf), region = 36 }
   0xc   : > { %v700_v0 = vld [vmem:[%s898_s1 + $0x38] sm:$0xff]  ;;  %v701_v1 = vld [vmem:[%s898_s1 + $0x40] sm:$0xff]  ;;  %v699_v2 = vld [vmem:[%s898_s1 + $0x30] sm:$0xff]  ;;  %s907_s15 = smov (!%p244_p4, %s769_s15), 1  ;;  %vm392_vm0 = vcmask 130048  }
   0xd   : > { %405 = vmatpush.bf16.msra.mxu0 %v700_v0  ;;  %721 = vmatpush.bf16.msra.mxu2 %v700_v0  ;;  %s683_s25 = sshll.u32 %s907_s15, 6  ;;  %v698_v3 = vld [vmem:[%s898_s1 + $0x28] sm:$0xff]  ;;  %v697_v9 = vld [vmem:[%s898_s1 + $0x20] sm:$0xff]  ;;  %v696_v11 = vld [vmem:[%s898_s1 + $0x18] sm:$0xff]  ;;  %s684_s19 = sshll.u32 %s907_s15, 5 }
   0xe   : > { %729 = vmatpush.bf16.msra.mxu3 %v701_v1  ;;  %441 = vmatpush.bf16.msra.mxu1 %v701_v1  ;;  %s837_s28 = scalar_lea.vmem %s897_s0, %s683_s25  ;;  %v695_v12 = vld [vmem:[%s898_s1 + $0x10] sm:$0xff]  ;;  %v694_v16 = vld [vmem:[%s898_s1 + $0x8] sm:$0xff]  ;;  %v693_v17 = vld [vmem:[%s898_s1] sm:$0xff]  ;;  %s262_s24 = scalar_lea.vmem %s900_s3, %s684_s19 }
   0xf   : > { %v687_v4 = vld [vmem:[%s837_s28 + $0x14] sm:$0xf]  ;;  %v621_v5 = vld [vmem:[%s837_s28 + $0x18] sm:$0xf0]  ;;  %v685_v7 = vld [vmem:[%s837_s28 + $0x4] sm:$0xf] }
  0x10   : > { %v624_v6 = vor.u32 %v687_v4, %v621_v5  ;;  %v613_v8 = vld [vmem:[%s837_s28 + $0x8] sm:$0xf0]  ;;  %v689_v13 = vld [vmem:[%s837_s28 + $0x24] sm:$0xf]  ;;  %v611_v18 = vld [vmem:[%s837_s28] sm:$0xf] }
  0x11   : > { %406 = vmatpush.bf16.msra.mxu0 %v699_v2  ;;  %722 = vmatpush.bf16.msra.mxu2 %v699_v2  ;;  %v616_v10 = vor.u32 %v685_v7, %v613_v8  ;;  %v629_v14 = vld [vmem:[%s837_s28 + $0x28] sm:$0xf0]  ;;  %v686_v19 = vld [vmem:[%s837_s28 + $0x4] sm:$0xf0]  ;;  %v627_v20 = vld [vmem:[%s837_s28 + $0x20] sm:$0xf] }
  0x12   : > { %678 = vmatmul.msk.bf16.vlgmr.msra.gmra.mxu3 %vm392_vm0, %v624_v6  ;;  %v632_v15 = vor.u32 %v689_v13, %v629_v14  ;;  %v690_v21 = vld [vmem:[%s837_s28 + $0x24] sm:$0xf0]  ;;  %v612_v22 = vor.u32 %v686_v19, %v611_v18  ;;  %v691_v24 = vld [vmem:[%s837_s28 + $0x34] sm:$0xf]  ;;  %v637_v25 = vld [vmem:[%s837_s28 + $0x38] sm:$0xf0] }
  0x13   : > { %677 = vmatmul.msk.bf16.vlgmr.msra.gmra.mxu1 %vm392_vm0, %v616_v10  ;;  %v628_v23 = vor.u32 %v690_v21, %v627_v20  ;;  %v640_v26 = vor.u32 %v691_v24, %v637_v25  ;;  %v619_v27 = vld [vmem:[%s837_s28 + $0x10] sm:$0xf]  ;;  %v688_v28 = vld [vmem:[%s837_s28 + $0x14] sm:$0xf0]  ;;  %v754_v41 = vld [vmem:[%s899_s2] ss:$0 sm:$0xff] }
  0x14   : > { %v635_v29 = vld [vmem:[%s837_s28 + $0x30] sm:$0xf]  ;;  %v692_v30 = vld [vmem:[%s837_s28 + $0x34] sm:$0xf0]  ;;  %v620_v31 = vor.u32 %v688_v28, %v619_v27  ;;  %v703_v48 = vld [vmem:[%s262_s24] sm:$0xff]   ;;  %s608_s25 = sshll.u32 %s907_s15, 3 }
  0x15   : > { %407 = vmatpush.bf16.msra.mxu0 %v698_v3  ;;  %723 = vmatpush.bf16.msra.mxu2 %v698_v3  ;;  %v636_v32 = vor.u32 %v692_v30, %v635_v29  ;;  %v718_v49 = vld [vmem:[%s262_s24 + $0x8] sm:$0xff]   ;;  %v705_v51 = vunpack.c.h.bf16 %v703_v48  ;;  %v704_v53 = vunpack.c.l.bf16 %v703_v48  ;;  %v719_v59 = vld [vmem:[%s262_s24 + $0x10] sm:$0xff]   ;;  %v720_v7 = vld [vmem:[%s262_s24 + $0x18] sm:$0xff]   ;;  %s270_s28 = scalar_lea.vmem %s901_s4, %s608_s25 }
  0x16   : > { %v708_v55 = vunpack.c.l.bf16 %v718_v49  ;;  %v709_v62 = vunpack.c.h.bf16 %v718_v49  ;;  %v712_v3 = vunpack.c.l.bf16 %v719_v59  ;;  %v713_v10 = vunpack.c.h.bf16 %v719_v59 }
  0x17   : > { %v716_v13 = vunpack.c.l.bf16 %v720_v7 }
  0x19   : > { %408 = vmatpush.bf16.msra.mxu0 %v697_v9  ;;  %724 = vmatpush.bf16.msra.mxu2 %v697_v9 }
  0x1d   : > { %409 = vmatpush.bf16.msra.mxu0 %v696_v11  ;;  %725 = vmatpush.bf16.msra.mxu2 %v696_v11 }
  0x21   : > { %410 = vmatpush.bf16.msra.mxu0 %v695_v12  ;;  %726 = vmatpush.bf16.msra.mxu2 %v695_v12 }
  0x22   : > { %679 = vmatmul.msk.bf16.gmra.mxu3 %vm392_vm0, %v632_v15 }
  0x25   : > { %411 = vmatpush.bf16.msra.mxu0 %v694_v16  ;;  %727 = vmatpush.bf16.msra.mxu2 %v694_v16 }
  0x29   : > { %412 = vmatpush.bf16.msra.mxu0 %v693_v17  ;;  %728 = vmatpush.bf16.msra.mxu2 %v693_v17 }
  0x2c   : > { %413 = vmatmul.bf16.vlgmr.msra.gmra.mxu0 %v612_v22  ;;  %423 = vmatmul.bf16.vlgmr.msra.gmra.mxu2 %v628_v23  ;;  %v717_v23 = vunpack.c.h.bf16 %v720_v7 }
  0x32   : > { %680 = vmatmul.msk.bf16.gmra.mxu3 %vm392_vm0, %v640_v26 }
  0x3c   : > { %418 = vmatmul.bf16.gmra.mxu0 %v620_v31  ;;  %428 = vmatmul.bf16.gmra.mxu2 %v636_v32 }
  0x90   : > { %v443_v37 = vpop.f32.mrf.mxu1 }
  0x95   : > { %v448_v33 = vpop.f32.mrf.mxu3 }
  0x98   : > { %v445_v44 = vpop.f32.mrf.mxu1 }
  0x9d   : > { %v450_v34 = vpop.f32.mrf.mxu3 }
  0xa5   : > { %v453_v36 = vpop.f32.mrf.mxu3 }
  0xa9   : > { %v414_v35 = vpop.f32.mrf.mxu0 }
  0xaa   : > { %v415_v46 = vadd.f32 %v754_v41, %v414_v35 }
  0xac   : > { %v444_v52 = vadd.f32 %v443_v37, %v415_v46 }
  0xad   : > { %v455_v40 = vpop.f32.mrf.mxu3 }
  0xae   : > { %v479_v63 = vmul.f32 %v704_v53, %v444_v52 }
  0xaf   : > { %v424_v38 = vpop.f32.mrf.mxu2 }
  0xb0   : > { %v425_v58 = vadd.f32 %v754_v41, %v424_v38 }
  0xb1   : > { %v416_v39 = vpop.f32.mrf.mxu0 }
  0xb2   : > { %v417_v43 = vadd.f32 %v754_v41, %v416_v39  ;;  %v454_v4 = vadd.f32 %v453_v36, %v425_v58 }
  0xb4   : > { %v446_v50 = vadd.f32 %v445_v44, %v417_v43  ;;  %v483_v15 = vmul.f32 %v712_v3, %v454_v4 }
  0xb5   : > { %v458_v56 = vpop.f32.mrf.mxu3 }
  0xb6   : > { %v480_v60 = vmul.f32 %v705_v51, %v446_v50 }
  0xb7   : > { %v426_v42 = vpop.f32.mrf.mxu2 }
  0xb8   : > { %v427_v0 = vadd.f32 %v754_v41, %v426_v42  ;;  %v487_v5 = vadd.f32 %v480_v60, %v479_v63 }
  0xb9   : > { %v419_v45 = vpop.f32.mrf.mxu0 }
  0xba   : > { %v420_v47 = vadd.f32 %v754_v41, %v419_v45  ;;  %v456_v9 = vadd.f32 %v455_v40, %v427_v0 }
  0xbc   : > { %v449_v54 = vadd.f32 %v448_v33, %v420_v47  ;;  %v484_v20 = vmul.f32 %v713_v10, %v456_v9 }
  0xbd   : > { %v460_v19 = vpop.f32.mrf.mxu3 }
  0xbe   : > { %v481_v1 = vmul.f32 %v708_v55, %v449_v54 }
  0xbf   : > { %v429_v57 = vpop.f32.mrf.mxu2 }
  0xc0   : > { %v430_v6 = vadd.f32 %v754_v41, %v429_v57  ;;  %v488_v11 = vadd.f32 %v487_v5, %v481_v1 }
  0xc1   : > { %v421_v61 = vpop.f32.mrf.mxu0 }
  0xc2   : > { %v422_v2 = vadd.f32 %v754_v41, %v421_v61  ;;  %v459_v16 = vadd.f32 %v458_v56, %v430_v6 }
  0xc4   : > { %v451_v8 = vadd.f32 %v450_v34, %v422_v2  ;;  %v485_v24 = vmul.f32 %v716_v13, %v459_v16 }
  0xc6   : > { %v482_v12 = vmul.f32 %v709_v62, %v451_v8 }
  0xc7   : > { %v431_v14 = vpop.f32.mrf.mxu2 }
  0xc8   : > { %v489_v17 = vadd.f32 %v488_v11, %v482_v12  ;;  %v432_v18 = vadd.f32 %v754_v41, %v431_v14 }
  0xca   : > { %v490_v21 = vadd.f32 %v489_v17, %v483_v15  ;;  %v461_v22 = vadd.f32 %v460_v19, %v432_v18 }
  0xcc   : > { %v491_v25 = vadd.f32 %v490_v21, %v484_v20  ;;  %v486_v26 = vmul.f32 %v717_v23, %v461_v22 }
  0xce   : > { %v492_v27 = vadd.f32 %v491_v25, %v485_v24 }
  0xd0   : > { %v493_v28 = vadd.f32 %v492_v27, %v486_v26 }
  0xd2   : > { %v494_v29 = vrot.slane %v493_v28, 4 }
  0xd4   : > { %v495_v30 = vadd.f32 %v494_v29, %v493_v28 }
  0xd6   : > { %v496_v31 = vrot.slane %v495_v30, 2 }
  0xd8   : > { %v497_v32 = vadd.f32 %v496_v31, %v495_v30 }
  0xda   : > { %v498_v33 = vrot.slane %v497_v32, 1 }
  0xdc   : > { %v499_v34 = vadd.f32 %v498_v33, %v497_v32 }
  0xde   : > { %500 = vst [vmem:[%s270_s28] sm:$0xff] %v499_v34 }
  0xdf PF: > { %s14_s17 = sadd.s32 1, %s777_s17   ;;  %s902_s15 = smov %s773_s16 }
  0xe0   : > { %p11_p5 = scmp.ge.s32.totalorder %s14_s17, 4   ;;  %s903_s16 = smov %s905_s18 }
  0xe2   :  { %13 = sbr.rel (!%p11_p5) target bundleno = 2 (0x2), region = 69 }

</bundles_post_ra>
